<compile_context>
chip_gen: v6e
topology: v6e:2x2x1
jax: 0.10.0
libtpu: 0.0.40
codegen_flags: <defaults>
</compile_context>

<pallas_src>
import functools

import numpy as np

import jax
import jax.numpy as jnp
from jax.experimental import pallas as pl
from jax.experimental.pallas import tpu as pltpu


def _round_up(v, m):
    return (v + m - 1) // m * m


# ----------------------------------------------------------------------------
# Fused kernel
# ----------------------------------------------------------------------------
def fused_forward_kernel(xpad_ref, vmask_ref, gsel_ref,
                         w1_ref, b1_ref, w2_ref, b2_ref,
                         wfc1_ref, bfc1_ref, wfc2_ref, bfc2_ref,
                         wcls_ref, bcls_ref,
                         o_ref,
                         pad2_ref, h2_ref, flat_ref,
                         *, wp, n_imgs, f_spatial):
    """Whole BaselineCNN forward (eval mode), everything VMEM resident.

    xpad_ref : (8, LP)            f32  conv1 input, channel-major, zero-padded
                                       halo, flattened spatial on lanes
    vmask_ref: (1, LQ)            f32  1.0 on valid output lanes, else 0.0
    gsel_ref : (LSEL, N*F)        bf16 0/1 gather matrix (maxpool anchor lanes)
    w1/w2    : (9, Cout, Cin8)    bf16 conv taps, tap index = kh*3+kw
    b1/b2    : (Cout, 1)          f32  channel-first conv bias
    wfc*     : (in, out)          bf16 ;  bfc* : (1, out) f32
    o_ref    : (N, num_classes)   f32  softmax probabilities
    pad2_ref : (C1, LP)           f32  conv2 zero-padded input scratch
    h2_ref   : (C2, LQ)           f32  conv2 output scratch (pooling source)
    flat_ref : (8, C2*F)          f32  sample-major flatten rows
    """
    lq = vmask_ref.shape[1]           # conv output lane extent
    lsel = gsel_ref.shape[0]          # lanes fed to the pooling gather matmul
    c2 = w2_ref.shape[1]
    offs = tuple(kh * wp + kw for kh in range(3) for kw in range(3))

    def conv3x3(src_ref, w_ref, b_ref):
        # 3x3 / stride 1 / pad 1 cross-correlation, channels-first:
        #   acc[co, q] = sum_k sum_ci W_k[co, ci] * src[ci, q + off_k]
        # lane-dense f32 accumulator: (Cout, LQ) ~ 5 vregs -> no spills.
        acc = jnp.zeros((w_ref.shape[1], lq), jnp.float32)
        for k, off in enumerate(offs):
            patch = src_ref[:, off:off + lq].astype(jnp.bfloat16)
            acc = acc + jnp.dot(w_ref[k], patch,
                                preferred_element_type=jnp.float32)
        return acc + b_ref[...]       # (Cout, 1) broadcast over lanes

    # ---- conv1 (input already halo-padded / flattened by the wrapper) -------
    h1 = conv3x3(xpad_ref, w1_ref, b1_ref) * vmask_ref[...]
    # vmask zeroes every out-of-image lane so those lanes become exactly the
    # zero halo ring of conv2's padded input below.

    # ---- conv2: zero the (tiny) halo scratch, drop conv1's output in shifted -
    pad2_ref[...] = jnp.zeros_like(pad2_ref)
    pad2_ref[:, wp + 1:wp + 1 + lq] = h1          # interior = h1 shifted by Wp+1
    h2_ref[...] = conv3x3(pad2_ref, w2_ref, b2_ref)

    # ---- maxpool 2x2 stride 2 via 4 lane-shifted reads (dropout1 = identity) -
    m = jnp.maximum(
        jnp.maximum(h2_ref[:, 0:lsel], h2_ref[:, 1:1 + lsel]),
        jnp.maximum(h2_ref[:, wp:wp + lsel], h2_ref[:, wp + 1:wp + 1 + lsel]))
    # Select the even-(i,j) anchor lanes and compact them with one constant
    # 0/1 matmul (MXU is idle anyway): pooled[c, n*F + i*W2 + j].
    pooled = jnp.dot(m.astype(jnp.bfloat16), gsel_ref[...],
                     preferred_element_type=jnp.float32)       # (C2, N*F)

    # ---- flatten to sample-major rows, PyTorch NCHW order (c*F + i*W2 + j) --
    flat_ref[...] = jnp.zeros_like(flat_ref)      # also zeroes the pad rows
    for n in range(n_imgs):
        for c in range(c2):
            flat_ref[n:n + 1, c * f_spatial:(c + 1) * f_spatial] = (
                pooled[c:c + 1, n * f_spatial:(n + 1) * f_spatial])

    # ---- fc1 -> fc2 -> classifier -> softmax (dropout2/3 = identity) --------
    flat = flat_ref[...].astype(jnp.bfloat16)                  # (8, C2*F)
    h = jnp.dot(flat, wfc1_ref[...],
                preferred_element_type=jnp.float32) + bfc1_ref[...]
    h = jnp.dot(h.astype(jnp.bfloat16), wfc2_ref[...],
                preferred_element_type=jnp.float32) + bfc2_ref[...]
    logits = jnp.dot(h.astype(jnp.bfloat16), wcls_ref[...],
                     preferred_element_type=jnp.float32) + bcls_ref[...]
    # Softmax is row-wise; the zero-padded rows [N:8] stay confined to
    # themselves and are dropped by the final slice.
    mx = jnp.max(logits, axis=-1, keepdims=True)
    e = jnp.exp(logits - mx)
    probs = e / jnp.sum(e, axis=-1, keepdims=True)   # exact div: rows sum to 1
    o_ref[...] = probs[0:n_imgs, :].astype(o_ref.dtype)


# ----------------------------------------------------------------------------
# Wrapper
# ----------------------------------------------------------------------------
@jax.jit
def baseline_cnn_forward(x_nchw, params):
    n, cin, h, w = x_nchw.shape
    assert h % 2 == 0 and w % 2 == 0 and n <= 8
    c_in_pad = params["w_conv1"].shape[2]
    c1 = params["w_conv1"].shape[1]
    c2 = params["w_conv2"].shape[1]
    nh1 = params["w_fc1"].shape[1]
    nh2 = params["w_fc2"].shape[1]
    ncls = params["w_cls"].shape[1]
    h2d, w2d = h // 2, w // 2
    f = h2d * w2d
    hp, wp = h + 2, w + 2
    s = hp * wp

    lq = _round_up((n - 1) * s + (h - 1) * wp + w, 128)        # conv out lanes
    lsel = _round_up((n - 1) * s + (h - 2) * wp + (w - 1), 8)  # pooling lanes
    lp = _round_up(max(lq + 2 * wp + 2, n * s), 128)           # padded-in lanes
    assert lsel + wp + 1 <= lq

    # Input prep (tiny one-off XLA ops): NCHW -> pad channels to a full
    # sublane group -> 1-px spatial halo -> channel-major flattened lanes.
    x = x_nchw.astype(jnp.float32)
    x = jnp.pad(x, ((0, 0), (0, c_in_pad - cin), (1, 1), (1, 1)))
    x = jnp.transpose(x, (1, 0, 2, 3)).reshape(c_in_pad, n * s)
    xpad = jnp.pad(x, ((0, 0), (0, lp - n * s)))

    # Validity mask over conv-output lanes (host-built constant).
    q = np.arange(lq)
    r = q % s
    valid = (q < n * s) & ((r // wp) < h) & ((r % wp) < w)
    vmask = jnp.asarray(valid[None, :].astype(np.float32))

    # 0/1 gather matrix: picks the 2x2-pool anchor lanes and compacts them to
    # pooled[c, n*F + i*W2 + j] with one MXU pass.
    g = np.zeros((lsel, n * f), np.float32)
    for b in range(n):
        for i in range(h2d):
            for j in range(w2d):
                g[b * s + (2 * i) * wp + (2 * j), b * f + i * w2d + j] = 1.0
    gsel = jnp.asarray(g, jnp.bfloat16)

    args = (xpad, vmask, gsel,
            params["w_conv1"], params["b_conv1"],
            params["w_conv2"], params["b_conv2"],
            params["w_fc1"], params["b_fc1"],
            params["w_fc2"], params["b_fc2"],
            params["w_cls"], params["b_cls"])

    flops = (2 * 9 * lq * c1 * c_in_pad + 2 * 9 * lq * c2 * c1
             + 2 * lsel * c2 * n * f
             + 2 * 8 * c2 * f * nh1 + 2 * 8 * nh1 * nh2 + 2 * 8 * nh2 * ncls)
    bytes_accessed = int(sum(a.size * a.dtype.itemsize for a in args)
                         + n * ncls * 4)

    vmem = pl.BlockSpec(memory_space=pltpu.MemorySpace.VMEM)
    return pl.pallas_call(
        functools.partial(fused_forward_kernel, wp=wp, n_imgs=n, f_spatial=f),
        out_shape=jax.ShapeDtypeStruct((n, ncls), jnp.float32),
        in_specs=[vmem] * len(args),
        out_specs=vmem,
        scratch_shapes=[
            pltpu.VMEM((c1, lp), jnp.float32),       # conv2 padded input
            pltpu.VMEM((c2, lq), jnp.float32),       # conv2 output (pool src)
            pltpu.VMEM((8, c2 * f), jnp.float32),    # sample-major flatten
        ],
        cost_estimate=pl.CostEstimate(
            flops=flops, transcendentals=8 * ncls,
            bytes_accessed=bytes_accessed),
        compiler_params=pltpu.CompilerParams(
            vmem_limit_bytes=16 * 1024 * 1024),
    )(*args)


# ----------------------------------------------------------------------------
# Parameters (PyTorch layouts converted once at init; weights stored bf16)
# ----------------------------------------------------------------------------
def init_params(key, *, input_filter, num_filters1, num_filters2,
                num_hidden, num_hidden2, num_classes, flattendim):
    ks = jax.random.split(key, 10)

    def conv_w(k, cout, cin):
        # PyTorch (Cout, Cin, 3, 3) -> (9, Cout, Cin_pad), tap index kh*3+kw,
        # Cin zero-padded to a full sublane group (8).
        cin_pad = _round_up(cin, 8)
        w_pt = jax.random.normal(k, (cout, cin, 3, 3), jnp.float32) * 0.05
        ww = jnp.transpose(w_pt, (2, 3, 0, 1)).reshape(9, cout, cin)
        ww = jnp.pad(ww, ((0, 0), (0, 0), (0, cin_pad - cin)))
        return ww.astype(jnp.bfloat16)

    def conv_b(k, cout):
        # channels-first conv bias: (Cout, 1) broadcasts over the lane dim
        return (jax.random.normal(k, (cout, 1)) * 0.05).astype(jnp.float32)

    def lin_w(k, out_f, in_f):
        # PyTorch Linear weight (out, in) -> (in, out)
        w_pt = jax.random.normal(k, (out_f, in_f), jnp.float32) * 0.05
        return jnp.transpose(w_pt).astype(jnp.bfloat16)

    def lin_b(k, nf):
        return (jax.random.normal(k, (1, nf)) * 0.05).astype(jnp.float32)

    return {
        "w_conv1": conv_w(ks[0], num_filters1, input_filter),
        "b_conv1": conv_b(ks[1], num_filters1),
        "w_conv2": conv_w(ks[2], num_filters2, num_filters1),
        "b_conv2": conv_b(ks[3], num_filters2),
        "w_fc1": lin_w(ks[4], num_hidden, flattendim),
        "b_fc1": lin_b(ks[5], num_hidden),
        "w_fc2": lin_w(ks[6], num_hidden2, num_hidden),
        "b_fc2": lin_b(ks[7], num_hidden2),
        "w_cls": lin_w(ks[8], num_classes, num_hidden2),
        "b_cls": lin_b(ks[9], num_classes),
    }


# ----------------------------------------------------------------------------
# Pure-JAX f32 reference (PyTorch forward semantics, eval mode)
# ----------------------------------------------------------------------------
def reference_forward(x_nchw, params):
    x = x_nchw.astype(jnp.float32)
    nb = x.shape[0]

    def conv(xin, w9, b):
        cout = w9.shape[1]
        cin = xin.shape[1]
        ww = w9.astype(jnp.float32).reshape(3, 3, cout, -1)[:, :, :, :cin]
        ww = jnp.transpose(ww, (2, 3, 0, 1))                  # (Cout, Cin, 3, 3)
        y = jax.lax.conv_general_dilated(
            xin, ww, window_strides=(1, 1), padding=((1, 1), (1, 1)),
            dimension_numbers=("NCHW", "OIHW", "NCHW"))
        return y + b.astype(jnp.float32).reshape(1, cout, 1, 1)

    hh = conv(x, params["w_conv1"], params["b_conv1"])
    hh = conv(hh, params["w_conv2"], params["b_conv2"])
    hh = jax.lax.reduce_window(hh, -jnp.inf, jax.lax.max,
                               (1, 1, 2, 2), (1, 1, 2, 2), "VALID")
    hh = hh.reshape(nb, -1)
    hh = hh @ params["w_fc1"].astype(jnp.float32) + params["b_fc1"]
    hh = hh @ params["w_fc2"].astype(jnp.float32) + params["b_fc2"]
    logits = hh @ params["w_cls"].astype(jnp.float32) + params["b_cls"]
    return jax.nn.softmax(logits, axis=1)


if __name__ == "__main__":
    # Small config consistent with the module's structure:
    img_dim = 16
    input_filter = 3
    num_filters1 = 8
    num_filters2 = 8
    num_hidden = 32
    num_hidden2 = 16
    num_classes = 26
    stridepool = 2
    flattendim = int((img_dim / stridepool) ** 2) * num_filters2  # 512

    key = jax.random.PRNGKey(0)
    k_x, k_p = jax.random.split(key)
    x = jax.random.normal(k_x, (2, input_filter, img_dim, img_dim), jnp.float32)
    params = init_params(
        k_p,
        input_filter=input_filter, num_filters1=num_filters1,
        num_filters2=num_filters2, num_hidden=num_hidden,
        num_hidden2=num_hidden2, num_classes=num_classes,
        flattendim=flattendim)

    out = baseline_cnn_forward(x, params)
    out = jax.block_until_ready(out)

    assert out.shape == (2, num_classes), out.shape
    assert jnp.allclose(jnp.sum(out, axis=1), 1.0, atol=1e-5)
    assert bool(jnp.all(jnp.isfinite(out)))

    # Numerical check against a pure-JAX f32 reference of the PyTorch forward.
    ref = jax.block_until_ready(reference_forward(x, params))
    max_err = float(jnp.max(jnp.abs(out - ref)))
    assert max_err < 3e-3, max_err

    print("KERNEL_OK")
</pallas_src>

<mosaic_0001>
module attributes {stable_mosaic.version = 11 : i64} {
  func.func @fused_forward_kernel(%arg0: memref<8x768xf32, #tpu.memory_space<vmem>>, %arg1: memref<1x640xf32, #tpu.memory_space<vmem>>, %arg2: memref<592x128xbf16, #tpu.memory_space<vmem>>, %arg3: memref<9x8x8xbf16, #tpu.memory_space<vmem>>, %arg4: memref<8x1xf32, #tpu.memory_space<vmem>>, %arg5: memref<9x8x8xbf16, #tpu.memory_space<vmem>>, %arg6: memref<8x1xf32, #tpu.memory_space<vmem>>, %arg7: memref<512x32xbf16, #tpu.memory_space<vmem>>, %arg8: memref<1x32xf32, #tpu.memory_space<vmem>>, %arg9: memref<32x16xbf16, #tpu.memory_space<vmem>>, %arg10: memref<1x16xf32, #tpu.memory_space<vmem>>, %arg11: memref<16x26xbf16, #tpu.memory_space<vmem>>, %arg12: memref<1x26xf32, #tpu.memory_space<vmem>>, %arg13: memref<2x26xf32, #tpu.memory_space<vmem>>, %arg14: memref<8x768xf32, #tpu.memory_space<vmem>>, %arg15: memref<8x640xf32, #tpu.memory_space<vmem>>, %arg16: memref<8x512xf32, #tpu.memory_space<vmem>>) attributes {dimension_semantics = [], scalar_prefetch = 0 : i64, scratch_operands = 3 : i64, tpu.core_type = #tpu.core_type<tc>} {
    %cst = arith.constant 0.000000e+00 : f32
    %0 = vector.broadcast %cst : f32 to vector<8x640xf32>
    %c0 = arith.constant 0 : index
    %c0_0 = arith.constant 0 : index
    %1 = vector.load %arg0[%c0, %c0_0] : memref<8x768xf32, #tpu.memory_space<vmem>>, vector<8x640xf32>
    %2 = arith.truncf %1 : vector<8x640xf32> to vector<8x640xbf16>
    %c0_1 = arith.constant 0 : index
    %c0_2 = arith.constant 0 : index
    %c0_3 = arith.constant 0 : index
    %3 = vector.load %arg3[%c0_1, %c0_2, %c0_3] : memref<9x8x8xbf16, #tpu.memory_space<vmem>>, vector<1x8x8xbf16>
    %4 = vector.shape_cast %3 : vector<1x8x8xbf16> to vector<8x8xbf16>
    %cst_4 = arith.constant dense<0.000000e+00> : vector<8x640xf32>
    %5 = tpu.matmul %4, %2, %cst_4 {dimension_numbers = #tpu.dot_dimension_numbers<[1], [0], [0], [1], [0, 0, 1, 1], [], []>} : vector<8x8xbf16>, vector<8x640xbf16>, vector<8x640xf32> -> vector<8x640xf32>
    %6 = arith.addf %0, %5 : vector<8x640xf32>
    %c0_5 = arith.constant 0 : index
    %c1 = arith.constant 1 : index
    %7 = vector.load %arg0[%c0_5, %c1] : memref<8x768xf32, #tpu.memory_space<vmem>>, vector<8x640xf32>
    %8 = arith.truncf %7 : vector<8x640xf32> to vector<8x640xbf16>
    %c1_6 = arith.constant 1 : index
    %c0_7 = arith.constant 0 : index
    %c0_8 = arith.constant 0 : index
    %9 = vector.load %arg3[%c1_6, %c0_7, %c0_8] : memref<9x8x8xbf16, #tpu.memory_space<vmem>>, vector<1x8x8xbf16>
    %10 = vector.shape_cast %9 : vector<1x8x8xbf16> to vector<8x8xbf16>
    %cst_9 = arith.constant dense<0.000000e+00> : vector<8x640xf32>
    %11 = tpu.matmul %10, %8, %cst_9 {dimension_numbers = #tpu.dot_dimension_numbers<[1], [0], [0], [1], [0, 0, 1, 1], [], []>} : vector<8x8xbf16>, vector<8x640xbf16>, vector<8x640xf32> -> vector<8x640xf32>
    %12 = arith.addf %6, %11 : vector<8x640xf32>
    %c0_10 = arith.constant 0 : index
    %c2 = arith.constant 2 : index
    %13 = vector.load %arg0[%c0_10, %c2] : memref<8x768xf32, #tpu.memory_space<vmem>>, vector<8x640xf32>
    %14 = arith.truncf %13 : vector<8x640xf32> to vector<8x640xbf16>
    %c2_11 = arith.constant 2 : index
    %c0_12 = arith.constant 0 : index
    %c0_13 = arith.constant 0 : index
    %15 = vector.load %arg3[%c2_11, %c0_12, %c0_13] : memref<9x8x8xbf16, #tpu.memory_space<vmem>>, vector<1x8x8xbf16>
    %16 = vector.shape_cast %15 : vector<1x8x8xbf16> to vector<8x8xbf16>
    %cst_14 = arith.constant dense<0.000000e+00> : vector<8x640xf32>
    %17 = tpu.matmul %16, %14, %cst_14 {dimension_numbers = #tpu.dot_dimension_numbers<[1], [0], [0], [1], [0, 0, 1, 1], [], []>} : vector<8x8xbf16>, vector<8x640xbf16>, vector<8x640xf32> -> vector<8x640xf32>
    %18 = arith.addf %12, %17 : vector<8x640xf32>
    %c0_15 = arith.constant 0 : index
    %c18 = arith.constant 18 : index
    %19 = vector.load %arg0[%c0_15, %c18] : memref<8x768xf32, #tpu.memory_space<vmem>>, vector<8x640xf32>
    %20 = arith.truncf %19 : vector<8x640xf32> to vector<8x640xbf16>
    %c3 = arith.constant 3 : index
    %c0_16 = arith.constant 0 : index
    %c0_17 = arith.constant 0 : index
    %21 = vector.load %arg3[%c3, %c0_16, %c0_17] : memref<9x8x8xbf16, #tpu.memory_space<vmem>>, vector<1x8x8xbf16>
    %22 = vector.shape_cast %21 : vector<1x8x8xbf16> to vector<8x8xbf16>
    %cst_18 = arith.constant dense<0.000000e+00> : vector<8x640xf32>
    %23 = tpu.matmul %22, %20, %cst_18 {dimension_numbers = #tpu.dot_dimension_numbers<[1], [0], [0], [1], [0, 0, 1, 1], [], []>} : vector<8x8xbf16>, vector<8x640xbf16>, vector<8x640xf32> -> vector<8x640xf32>
    %24 = arith.addf %18, %23 : vector<8x640xf32>
    %c0_19 = arith.constant 0 : index
    %c19 = arith.constant 19 : index
    %25 = vector.load %arg0[%c0_19, %c19] : memref<8x768xf32, #tpu.memory_space<vmem>>, vector<8x640xf32>
    %26 = arith.truncf %25 : vector<8x640xf32> to vector<8x640xbf16>
    %c4 = arith.constant 4 : index
    %c0_20 = arith.constant 0 : index
    %c0_21 = arith.constant 0 : index
    %27 = vector.load %arg3[%c4, %c0_20, %c0_21] : memref<9x8x8xbf16, #tpu.memory_space<vmem>>, vector<1x8x8xbf16>
    %28 = vector.shape_cast %27 : vector<1x8x8xbf16> to vector<8x8xbf16>
    %cst_22 = arith.constant dense<0.000000e+00> : vector<8x640xf32>
    %29 = tpu.matmul %28, %26, %cst_22 {dimension_numbers = #tpu.dot_dimension_numbers<[1], [0], [0], [1], [0, 0, 1, 1], [], []>} : vector<8x8xbf16>, vector<8x640xbf16>, vector<8x640xf32> -> vector<8x640xf32>
    %30 = arith.addf %24, %29 : vector<8x640xf32>
    %c0_23 = arith.constant 0 : index
    %c20 = arith.constant 20 : index
    %31 = vector.load %arg0[%c0_23, %c20] : memref<8x768xf32, #tpu.memory_space<vmem>>, vector<8x640xf32>
    %32 = arith.truncf %31 : vector<8x640xf32> to vector<8x640xbf16>
    %c5 = arith.constant 5 : index
    %c0_24 = arith.constant 0 : index
    %c0_25 = arith.constant 0 : index
    %33 = vector.load %arg3[%c5, %c0_24, %c0_25] : memref<9x8x8xbf16, #tpu.memory_space<vmem>>, vector<1x8x8xbf16>
    %34 = vector.shape_cast %33 : vector<1x8x8xbf16> to vector<8x8xbf16>
    %cst_26 = arith.constant dense<0.000000e+00> : vector<8x640xf32>
    %35 = tpu.matmul %34, %32, %cst_26 {dimension_numbers = #tpu.dot_dimension_numbers<[1], [0], [0], [1], [0, 0, 1, 1], [], []>} : vector<8x8xbf16>, vector<8x640xbf16>, vector<8x640xf32> -> vector<8x640xf32>
    %36 = arith.addf %30, %35 : vector<8x640xf32>
    %c0_27 = arith.constant 0 : index
    %c36 = arith.constant 36 : index
    %37 = vector.load %arg0[%c0_27, %c36] : memref<8x768xf32, #tpu.memory_space<vmem>>, vector<8x640xf32>
    %38 = arith.truncf %37 : vector<8x640xf32> to vector<8x640xbf16>
    %c6 = arith.constant 6 : index
    %c0_28 = arith.constant 0 : index
    %c0_29 = arith.constant 0 : index
    %39 = vector.load %arg3[%c6, %c0_28, %c0_29] : memref<9x8x8xbf16, #tpu.memory_space<vmem>>, vector<1x8x8xbf16>
    %40 = vector.shape_cast %39 : vector<1x8x8xbf16> to vector<8x8xbf16>
    %cst_30 = arith.constant dense<0.000000e+00> : vector<8x640xf32>
    %41 = tpu.matmul %40, %38, %cst_30 {dimension_numbers = #tpu.dot_dimension_numbers<[1], [0], [0], [1], [0, 0, 1, 1], [], []>} : vector<8x8xbf16>, vector<8x640xbf16>, vector<8x640xf32> -> vector<8x640xf32>
    %42 = arith.addf %36, %41 : vector<8x640xf32>
    %c0_31 = arith.constant 0 : index
    %c37 = arith.constant 37 : index
    %43 = vector.load %arg0[%c0_31, %c37] : memref<8x768xf32, #tpu.memory_space<vmem>>, vector<8x640xf32>
    %44 = arith.truncf %43 : vector<8x640xf32> to vector<8x640xbf16>
    %c7 = arith.constant 7 : index
    %c0_32 = arith.constant 0 : index
    %c0_33 = arith.constant 0 : index
    %45 = vector.load %arg3[%c7, %c0_32, %c0_33] : memref<9x8x8xbf16, #tpu.memory_space<vmem>>, vector<1x8x8xbf16>
    %46 = vector.shape_cast %45 : vector<1x8x8xbf16> to vector<8x8xbf16>
    %cst_34 = arith.constant dense<0.000000e+00> : vector<8x640xf32>
    %47 = tpu.matmul %46, %44, %cst_34 {dimension_numbers = #tpu.dot_dimension_numbers<[1], [0], [0], [1], [0, 0, 1, 1], [], []>} : vector<8x8xbf16>, vector<8x640xbf16>, vector<8x640xf32> -> vector<8x640xf32>
    %48 = arith.addf %42, %47 : vector<8x640xf32>
    %c0_35 = arith.constant 0 : index
    %c38 = arith.constant 38 : index
    %49 = vector.load %arg0[%c0_35, %c38] : memref<8x768xf32, #tpu.memory_space<vmem>>, vector<8x640xf32>
    %50 = arith.truncf %49 : vector<8x640xf32> to vector<8x640xbf16>
    %c8 = arith.constant 8 : index
    %c0_36 = arith.constant 0 : index
    %c0_37 = arith.constant 0 : index
    %51 = vector.load %arg3[%c8, %c0_36, %c0_37] : memref<9x8x8xbf16, #tpu.memory_space<vmem>>, vector<1x8x8xbf16>
    %52 = vector.shape_cast %51 : vector<1x8x8xbf16> to vector<8x8xbf16>
    %cst_38 = arith.constant dense<0.000000e+00> : vector<8x640xf32>
    %53 = tpu.matmul %52, %50, %cst_38 {dimension_numbers = #tpu.dot_dimension_numbers<[1], [0], [0], [1], [0, 0, 1, 1], [], []>} : vector<8x8xbf16>, vector<8x640xbf16>, vector<8x640xf32> -> vector<8x640xf32>
    %54 = arith.addf %48, %53 : vector<8x640xf32>
    %c0_39 = arith.constant 0 : index
    %c0_40 = arith.constant 0 : index
    %55 = vector.load %arg4[%c0_39, %c0_40] : memref<8x1xf32, #tpu.memory_space<vmem>>, vector<8x1xf32>
    %56 = vector.broadcast %55 : vector<8x1xf32> to vector<8x640xf32>
    %57 = arith.addf %54, %56 : vector<8x640xf32>
    %c0_41 = arith.constant 0 : index
    %c0_42 = arith.constant 0 : index
    %58 = vector.load %arg1[%c0_41, %c0_42] : memref<1x640xf32, #tpu.memory_space<vmem>>, vector<1x640xf32>
    %59 = vector.broadcast %58 : vector<1x640xf32> to vector<8x640xf32>
    %60 = arith.mulf %57, %59 : vector<8x640xf32>
    %cst_43 = arith.constant 0.000000e+00 : f32
    %61 = vector.broadcast %cst_43 : f32 to vector<8x768xf32>
    %c0_44 = arith.constant 0 : index
    %c0_45 = arith.constant 0 : index
    %62 = vector.load %arg14[%c0_44, %c0_45] : memref<8x768xf32, #tpu.memory_space<vmem>>, vector<8x768xf32>
    tpu.vector_store %arg14[%c0_44, %c0_45], %61 {strides = array<i32>} : memref<8x768xf32, #tpu.memory_space<vmem>>, vector<8x768xf32>,
    %c0_46 = arith.constant 0 : index
    %c19_47 = arith.constant 19 : index
    %63 = vector.load %arg14[%c0_46, %c19_47] : memref<8x768xf32, #tpu.memory_space<vmem>>, vector<8x640xf32>
    tpu.vector_store %arg14[%c0_46, %c19_47], %60 {strides = array<i32>} : memref<8x768xf32, #tpu.memory_space<vmem>>, vector<8x640xf32>,
    %cst_48 = arith.constant 0.000000e+00 : f32
    %64 = vector.broadcast %cst_48 : f32 to vector<8x640xf32>
    %c0_49 = arith.constant 0 : index
    %c0_50 = arith.constant 0 : index
    %65 = vector.load %arg14[%c0_49, %c0_50] : memref<8x768xf32, #tpu.memory_space<vmem>>, vector<8x640xf32>
    %66 = arith.truncf %65 : vector<8x640xf32> to vector<8x640xbf16>
    %c0_51 = arith.constant 0 : index
    %c0_52 = arith.constant 0 : index
    %c0_53 = arith.constant 0 : index
    %67 = vector.load %arg5[%c0_51, %c0_52, %c0_53] : memref<9x8x8xbf16, #tpu.memory_space<vmem>>, vector<1x8x8xbf16>
    %68 = vector.shape_cast %67 : vector<1x8x8xbf16> to vector<8x8xbf16>
    %cst_54 = arith.constant dense<0.000000e+00> : vector<8x640xf32>
    %69 = tpu.matmul %68, %66, %cst_54 {dimension_numbers = #tpu.dot_dimension_numbers<[1], [0], [0], [1], [0, 0, 1, 1], [], []>} : vector<8x8xbf16>, vector<8x640xbf16>, vector<8x640xf32> -> vector<8x640xf32>
    %70 = arith.addf %64, %69 : vector<8x640xf32>
    %c0_55 = arith.constant 0 : index
    %c1_56 = arith.constant 1 : index
    %71 = vector.load %arg14[%c0_55, %c1_56] : memref<8x768xf32, #tpu.memory_space<vmem>>, vector<8x640xf32>
    %72 = arith.truncf %71 : vector<8x640xf32> to vector<8x640xbf16>
    %c1_57 = arith.constant 1 : index
    %c0_58 = arith.constant 0 : index
    %c0_59 = arith.constant 0 : index
    %73 = vector.load %arg5[%c1_57, %c0_58, %c0_59] : memref<9x8x8xbf16, #tpu.memory_space<vmem>>, vector<1x8x8xbf16>
    %74 = vector.shape_cast %73 : vector<1x8x8xbf16> to vector<8x8xbf16>
    %cst_60 = arith.constant dense<0.000000e+00> : vector<8x640xf32>
    %75 = tpu.matmul %74, %72, %cst_60 {dimension_numbers = #tpu.dot_dimension_numbers<[1], [0], [0], [1], [0, 0, 1, 1], [], []>} : vector<8x8xbf16>, vector<8x640xbf16>, vector<8x640xf32> -> vector<8x640xf32>
    %76 = arith.addf %70, %75 : vector<8x640xf32>
    %c0_61 = arith.constant 0 : index
    %c2_62 = arith.constant 2 : index
    %77 = vector.load %arg14[%c0_61, %c2_62] : memref<8x768xf32, #tpu.memory_space<vmem>>, vector<8x640xf32>
    %78 = arith.truncf %77 : vector<8x640xf32> to vector<8x640xbf16>
    %c2_63 = arith.constant 2 : index
    %c0_64 = arith.constant 0 : index
    %c0_65 = arith.constant 0 : index
    %79 = vector.load %arg5[%c2_63, %c0_64, %c0_65] : memref<9x8x8xbf16, #tpu.memory_space<vmem>>, vector<1x8x8xbf16>
    %80 = vector.shape_cast %79 : vector<1x8x8xbf16> to vector<8x8xbf16>
    %cst_66 = arith.constant dense<0.000000e+00> : vector<8x640xf32>
    %81 = tpu.matmul %80, %78, %cst_66 {dimension_numbers = #tpu.dot_dimension_numbers<[1], [0], [0], [1], [0, 0, 1, 1], [], []>} : vector<8x8xbf16>, vector<8x640xbf16>, vector<8x640xf32> -> vector<8x640xf32>
    %82 = arith.addf %76, %81 : vector<8x640xf32>
    %c0_67 = arith.constant 0 : index
    %c18_68 = arith.constant 18 : index
    %83 = vector.load %arg14[%c0_67, %c18_68] : memref<8x768xf32, #tpu.memory_space<vmem>>, vector<8x640xf32>
    %84 = arith.truncf %83 : vector<8x640xf32> to vector<8x640xbf16>
    %c3_69 = arith.constant 3 : index
    %c0_70 = arith.constant 0 : index
    %c0_71 = arith.constant 0 : index
    %85 = vector.load %arg5[%c3_69, %c0_70, %c0_71] : memref<9x8x8xbf16, #tpu.memory_space<vmem>>, vector<1x8x8xbf16>
    %86 = vector.shape_cast %85 : vector<1x8x8xbf16> to vector<8x8xbf16>
    %cst_72 = arith.constant dense<0.000000e+00> : vector<8x640xf32>
    %87 = tpu.matmul %86, %84, %cst_72 {dimension_numbers = #tpu.dot_dimension_numbers<[1], [0], [0], [1], [0, 0, 1, 1], [], []>} : vector<8x8xbf16>, vector<8x640xbf16>, vector<8x640xf32> -> vector<8x640xf32>
    %88 = arith.addf %82, %87 : vector<8x640xf32>
    %c0_73 = arith.constant 0 : index
    %c19_74 = arith.constant 19 : index
    %89 = vector.load %arg14[%c0_73, %c19_74] : memref<8x768xf32, #tpu.memory_space<vmem>>, vector<8x640xf32>
    %90 = arith.truncf %89 : vector<8x640xf32> to vector<8x640xbf16>
    %c4_75 = arith.constant 4 : index
    %c0_76 = arith.constant 0 : index
    %c0_77 = arith.constant 0 : index
    %91 = vector.load %arg5[%c4_75, %c0_76, %c0_77] : memref<9x8x8xbf16, #tpu.memory_space<vmem>>, vector<1x8x8xbf16>
    %92 = vector.shape_cast %91 : vector<1x8x8xbf16> to vector<8x8xbf16>
    %cst_78 = arith.constant dense<0.000000e+00> : vector<8x640xf32>
    %93 = tpu.matmul %92, %90, %cst_78 {dimension_numbers = #tpu.dot_dimension_numbers<[1], [0], [0], [1], [0, 0, 1, 1], [], []>} : vector<8x8xbf16>, vector<8x640xbf16>, vector<8x640xf32> -> vector<8x640xf32>
    %94 = arith.addf %88, %93 : vector<8x640xf32>
    %c0_79 = arith.constant 0 : index
    %c20_80 = arith.constant 20 : index
    %95 = vector.load %arg14[%c0_79, %c20_80] : memref<8x768xf32, #tpu.memory_space<vmem>>, vector<8x640xf32>
    %96 = arith.truncf %95 : vector<8x640xf32> to vector<8x640xbf16>
    %c5_81 = arith.constant 5 : index
    %c0_82 = arith.constant 0 : index
    %c0_83 = arith.constant 0 : index
    %97 = vector.load %arg5[%c5_81, %c0_82, %c0_83] : memref<9x8x8xbf16, #tpu.memory_space<vmem>>, vector<1x8x8xbf16>
    %98 = vector.shape_cast %97 : vector<1x8x8xbf16> to vector<8x8xbf16>
    %cst_84 = arith.constant dense<0.000000e+00> : vector<8x640xf32>
    %99 = tpu.matmul %98, %96, %cst_84 {dimension_numbers = #tpu.dot_dimension_numbers<[1], [0], [0], [1], [0, 0, 1, 1], [], []>} : vector<8x8xbf16>, vector<8x640xbf16>, vector<8x640xf32> -> vector<8x640xf32>
    %100 = arith.addf %94, %99 : vector<8x640xf32>
    %c0_85 = arith.constant 0 : index
    %c36_86 = arith.constant 36 : index
    %101 = vector.load %arg14[%c0_85, %c36_86] : memref<8x768xf32, #tpu.memory_space<vmem>>, vector<8x640xf32>
    %102 = arith.truncf %101 : vector<8x640xf32> to vector<8x640xbf16>
    %c6_87 = arith.constant 6 : index
    %c0_88 = arith.constant 0 : index
    %c0_89 = arith.constant 0 : index
    %103 = vector.load %arg5[%c6_87, %c0_88, %c0_89] : memref<9x8x8xbf16, #tpu.memory_space<vmem>>, vector<1x8x8xbf16>
    %104 = vector.shape_cast %103 : vector<1x8x8xbf16> to vector<8x8xbf16>
    %cst_90 = arith.constant dense<0.000000e+00> : vector<8x640xf32>
    %105 = tpu.matmul %104, %102, %cst_90 {dimension_numbers = #tpu.dot_dimension_numbers<[1], [0], [0], [1], [0, 0, 1, 1], [], []>} : vector<8x8xbf16>, vector<8x640xbf16>, vector<8x640xf32> -> vector<8x640xf32>
    %106 = arith.addf %100, %105 : vector<8x640xf32>
    %c0_91 = arith.constant 0 : index
    %c37_92 = arith.constant 37 : index
    %107 = vector.load %arg14[%c0_91, %c37_92] : memref<8x768xf32, #tpu.memory_space<vmem>>, vector<8x640xf32>
    %108 = arith.truncf %107 : vector<8x640xf32> to vector<8x640xbf16>
    %c7_93 = arith.constant 7 : index
    %c0_94 = arith.constant 0 : index
    %c0_95 = arith.constant 0 : index
    %109 = vector.load %arg5[%c7_93, %c0_94, %c0_95] : memref<9x8x8xbf16, #tpu.memory_space<vmem>>, vector<1x8x8xbf16>
    %110 = vector.shape_cast %109 : vector<1x8x8xbf16> to vector<8x8xbf16>
    %cst_96 = arith.constant dense<0.000000e+00> : vector<8x640xf32>
    %111 = tpu.matmul %110, %108, %cst_96 {dimension_numbers = #tpu.dot_dimension_numbers<[1], [0], [0], [1], [0, 0, 1, 1], [], []>} : vector<8x8xbf16>, vector<8x640xbf16>, vector<8x640xf32> -> vector<8x640xf32>
    %112 = arith.addf %106, %111 : vector<8x640xf32>
    %c0_97 = arith.constant 0 : index
    %c38_98 = arith.constant 38 : index
    %113 = vector.load %arg14[%c0_97, %c38_98] : memref<8x768xf32, #tpu.memory_space<vmem>>, vector<8x640xf32>
    %114 = arith.truncf %113 : vector<8x640xf32> to vector<8x640xbf16>
    %c8_99 = arith.constant 8 : index
    %c0_100 = arith.constant 0 : index
    %c0_101 = arith.constant 0 : index
    %115 = vector.load %arg5[%c8_99, %c0_100, %c0_101] : memref<9x8x8xbf16, #tpu.memory_space<vmem>>, vector<1x8x8xbf16>
    %116 = vector.shape_cast %115 : vector<1x8x8xbf16> to vector<8x8xbf16>
    %cst_102 = arith.constant dense<0.000000e+00> : vector<8x640xf32>
    %117 = tpu.matmul %116, %114, %cst_102 {dimension_numbers = #tpu.dot_dimension_numbers<[1], [0], [0], [1], [0, 0, 1, 1], [], []>} : vector<8x8xbf16>, vector<8x640xbf16>, vector<8x640xf32> -> vector<8x640xf32>
    %118 = arith.addf %112, %117 : vector<8x640xf32>
    %c0_103 = arith.constant 0 : index
    %c0_104 = arith.constant 0 : index
    %119 = vector.load %arg6[%c0_103, %c0_104] : memref<8x1xf32, #tpu.memory_space<vmem>>, vector<8x1xf32>
    %120 = vector.broadcast %119 : vector<8x1xf32> to vector<8x640xf32>
    %121 = arith.addf %118, %120 : vector<8x640xf32>
    %c0_105 = arith.constant 0 : index
    %c0_106 = arith.constant 0 : index
    %122 = vector.load %arg15[%c0_105, %c0_106] : memref<8x640xf32, #tpu.memory_space<vmem>>, vector<8x640xf32>
    tpu.vector_store %arg15[%c0_105, %c0_106], %121 {strides = array<i32>} : memref<8x640xf32, #tpu.memory_space<vmem>>, vector<8x640xf32>,
    %c0_107 = arith.constant 0 : index
    %c0_108 = arith.constant 0 : index
    %123 = vector.load %arg15[%c0_107, %c0_108] : memref<8x640xf32, #tpu.memory_space<vmem>>, vector<8x592xf32>
    %c0_109 = arith.constant 0 : index
    %c1_110 = arith.constant 1 : index
    %124 = vector.load %arg15[%c0_109, %c1_110] : memref<8x640xf32, #tpu.memory_space<vmem>>, vector<8x592xf32>
    %125 = arith.maximumf %123, %124 : vector<8x592xf32>
    %c0_111 = arith.constant 0 : index
    %c18_112 = arith.constant 18 : index
    %126 = vector.load %arg15[%c0_111, %c18_112] : memref<8x640xf32, #tpu.memory_space<vmem>>, vector<8x592xf32>
    %c0_113 = arith.constant 0 : index
    %c19_114 = arith.constant 19 : index
    %127 = vector.load %arg15[%c0_113, %c19_114] : memref<8x640xf32, #tpu.memory_space<vmem>>, vector<8x592xf32>
    %128 = arith.maximumf %126, %127 : vector<8x592xf32>
    %129 = arith.maximumf %125, %128 : vector<8x592xf32>
    %130 = arith.truncf %129 : vector<8x592xf32> to vector<8x592xbf16>
    %c0_115 = arith.constant 0 : index
    %c0_116 = arith.constant 0 : index
    %131 = vector.load %arg2[%c0_115, %c0_116] : memref<592x128xbf16, #tpu.memory_space<vmem>>, vector<592x128xbf16>
    %cst_117 = arith.constant dense<0.000000e+00> : vector<8x128xf32>
    %132 = tpu.matmul %130, %131, %cst_117 {dimension_numbers = #tpu.dot_dimension_numbers<[1], [0], [0], [1], [0, 0, 1, 1], [], []>} : vector<8x592xbf16>, vector<592x128xbf16>, vector<8x128xf32> -> vector<8x128xf32>
    %cst_118 = arith.constant 0.000000e+00 : f32
    %133 = vector.broadcast %cst_118 : f32 to vector<8x512xf32>
    %c0_119 = arith.constant 0 : index
    %c0_120 = arith.constant 0 : index
    %134 = vector.load %arg16[%c0_119, %c0_120] : memref<8x512xf32, #tpu.memory_space<vmem>>, vector<8x512xf32>
    tpu.vector_store %arg16[%c0_119, %c0_120], %133 {strides = array<i32>} : memref<8x512xf32, #tpu.memory_space<vmem>>, vector<8x512xf32>,
    %135 = vector.extract_strided_slice %132 {offsets = [0, 0], sizes = [1, 64], strides = [1, 1]} : vector<8x128xf32> to vector<1x64xf32>
    %c0_121 = arith.constant 0 : index
    %c0_122 = arith.constant 0 : index
    %136 = vector.load %arg16[%c0_121, %c0_122] : memref<8x512xf32, #tpu.memory_space<vmem>>, vector<1x64xf32>
    tpu.vector_store %arg16[%c0_121, %c0_122], %135 {strides = array<i32>} : memref<8x512xf32, #tpu.memory_space<vmem>>, vector<1x64xf32>,
    %137 = vector.extract_strided_slice %132 {offsets = [1, 0], sizes = [1, 64], strides = [1, 1]} : vector<8x128xf32> to vector<1x64xf32>
    %c0_123 = arith.constant 0 : index
    %c64 = arith.constant 64 : index
    %138 = vector.load %arg16[%c0_123, %c64] : memref<8x512xf32, #tpu.memory_space<vmem>>, vector<1x64xf32>
    tpu.vector_store %arg16[%c0_123, %c64], %137 {strides = array<i32>} : memref<8x512xf32, #tpu.memory_space<vmem>>, vector<1x64xf32>,
    %139 = vector.extract_strided_slice %132 {offsets = [2, 0], sizes = [1, 64], strides = [1, 1]} : vector<8x128xf32> to vector<1x64xf32>
    %c0_124 = arith.constant 0 : index
    %c128 = arith.constant 128 : index
    %140 = vector.load %arg16[%c0_124, %c128] : memref<8x512xf32, #tpu.memory_space<vmem>>, vector<1x64xf32>
    tpu.vector_store %arg16[%c0_124, %c128], %139 {strides = array<i32>} : memref<8x512xf32, #tpu.memory_space<vmem>>, vector<1x64xf32>,
    %141 = vector.extract_strided_slice %132 {offsets = [3, 0], sizes = [1, 64], strides = [1, 1]} : vector<8x128xf32> to vector<1x64xf32>
    %c0_125 = arith.constant 0 : index
    %c192 = arith.constant 192 : index
    %142 = vector.load %arg16[%c0_125, %c192] : memref<8x512xf32, #tpu.memory_space<vmem>>, vector<1x64xf32>
    tpu.vector_store %arg16[%c0_125, %c192], %141 {strides = array<i32>} : memref<8x512xf32, #tpu.memory_space<vmem>>, vector<1x64xf32>,
    %143 = vector.extract_strided_slice %132 {offsets = [4, 0], sizes = [1, 64], strides = [1, 1]} : vector<8x128xf32> to vector<1x64xf32>
    %c0_126 = arith.constant 0 : index
    %c256 = arith.constant 256 : index
    %144 = vector.load %arg16[%c0_126, %c256] : memref<8x512xf32, #tpu.memory_space<vmem>>, vector<1x64xf32>
    tpu.vector_store %arg16[%c0_126, %c256], %143 {strides = array<i32>} : memref<8x512xf32, #tpu.memory_space<vmem>>, vector<1x64xf32>,
    %145 = vector.extract_strided_slice %132 {offsets = [5, 0], sizes = [1, 64], strides = [1, 1]} : vector<8x128xf32> to vector<1x64xf32>
    %c0_127 = arith.constant 0 : index
    %c320 = arith.constant 320 : index
    %146 = vector.load %arg16[%c0_127, %c320] : memref<8x512xf32, #tpu.memory_space<vmem>>, vector<1x64xf32>
    tpu.vector_store %arg16[%c0_127, %c320], %145 {strides = array<i32>} : memref<8x512xf32, #tpu.memory_space<vmem>>, vector<1x64xf32>,
    %147 = vector.extract_strided_slice %132 {offsets = [6, 0], sizes = [1, 64], strides = [1, 1]} : vector<8x128xf32> to vector<1x64xf32>
    %c0_128 = arith.constant 0 : index
    %c384 = arith.constant 384 : index
    %148 = vector.load %arg16[%c0_128, %c384] : memref<8x512xf32, #tpu.memory_space<vmem>>, vector<1x64xf32>
    tpu.vector_store %arg16[%c0_128, %c384], %147 {strides = array<i32>} : memref<8x512xf32, #tpu.memory_space<vmem>>, vector<1x64xf32>,
    %149 = vector.extract_strided_slice %132 {offsets = [7, 0], sizes = [1, 64], strides = [1, 1]} : vector<8x128xf32> to vector<1x64xf32>
    %c0_129 = arith.constant 0 : index
    %c448 = arith.constant 448 : index
    %150 = vector.load %arg16[%c0_129, %c448] : memref<8x512xf32, #tpu.memory_space<vmem>>, vector<1x64xf32>
    tpu.vector_store %arg16[%c0_129, %c448], %149 {strides = array<i32>} : memref<8x512xf32, #tpu.memory_space<vmem>>, vector<1x64xf32>,
    %151 = vector.extract_strided_slice %132 {offsets = [0, 64], sizes = [1, 64], strides = [1, 1]} : vector<8x128xf32> to vector<1x64xf32>
    %c1_130 = arith.constant 1 : index
    %c0_131 = arith.constant 0 : index
    %152 = vector.load %arg16[%c1_130, %c0_131] : memref<8x512xf32, #tpu.memory_space<vmem>>, vector<1x64xf32>
    tpu.vector_store %arg16[%c1_130, %c0_131], %151 {strides = array<i32>} : memref<8x512xf32, #tpu.memory_space<vmem>>, vector<1x64xf32>,
    %153 = vector.extract_strided_slice %132 {offsets = [1, 64], sizes = [1, 64], strides = [1, 1]} : vector<8x128xf32> to vector<1x64xf32>
    %c1_132 = arith.constant 1 : index
    %c64_133 = arith.constant 64 : index
    %154 = vector.load %arg16[%c1_132, %c64_133] : memref<8x512xf32, #tpu.memory_space<vmem>>, vector<1x64xf32>
    tpu.vector_store %arg16[%c1_132, %c64_133], %153 {strides = array<i32>} : memref<8x512xf32, #tpu.memory_space<vmem>>, vector<1x64xf32>,
    %155 = vector.extract_strided_slice %132 {offsets = [2, 64], sizes = [1, 64], strides = [1, 1]} : vector<8x128xf32> to vector<1x64xf32>
    %c1_134 = arith.constant 1 : index
    %c128_135 = arith.constant 128 : index
    %156 = vector.load %arg16[%c1_134, %c128_135] : memref<8x512xf32, #tpu.memory_space<vmem>>, vector<1x64xf32>
    tpu.vector_store %arg16[%c1_134, %c128_135], %155 {strides = array<i32>} : memref<8x512xf32, #tpu.memory_space<vmem>>, vector<1x64xf32>,
    %157 = vector.extract_strided_slice %132 {offsets = [3, 64], sizes = [1, 64], strides = [1, 1]} : vector<8x128xf32> to vector<1x64xf32>
    %c1_136 = arith.constant 1 : index
    %c192_137 = arith.constant 192 : index
    %158 = vector.load %arg16[%c1_136, %c192_137] : memref<8x512xf32, #tpu.memory_space<vmem>>, vector<1x64xf32>
    tpu.vector_store %arg16[%c1_136, %c192_137], %157 {strides = array<i32>} : memref<8x512xf32, #tpu.memory_space<vmem>>, vector<1x64xf32>,
    %159 = vector.extract_strided_slice %132 {offsets = [4, 64], sizes = [1, 64], strides = [1, 1]} : vector<8x128xf32> to vector<1x64xf32>
    %c1_138 = arith.constant 1 : index
    %c256_139 = arith.constant 256 : index
    %160 = vector.load %arg16[%c1_138, %c256_139] : memref<8x512xf32, #tpu.memory_space<vmem>>, vector<1x64xf32>
    tpu.vector_store %arg16[%c1_138, %c256_139], %159 {strides = array<i32>} : memref<8x512xf32, #tpu.memory_space<vmem>>, vector<1x64xf32>,
    %161 = vector.extract_strided_slice %132 {offsets = [5, 64], sizes = [1, 64], strides = [1, 1]} : vector<8x128xf32> to vector<1x64xf32>
    %c1_140 = arith.constant 1 : index
    %c320_141 = arith.constant 320 : index
    %162 = vector.load %arg16[%c1_140, %c320_141] : memref<8x512xf32, #tpu.memory_space<vmem>>, vector<1x64xf32>
    tpu.vector_store %arg16[%c1_140, %c320_141], %161 {strides = array<i32>} : memref<8x512xf32, #tpu.memory_space<vmem>>, vector<1x64xf32>,
    %163 = vector.extract_strided_slice %132 {offsets = [6, 64], sizes = [1, 64], strides = [1, 1]} : vector<8x128xf32> to vector<1x64xf32>
    %c1_142 = arith.constant 1 : index
    %c384_143 = arith.constant 384 : index
    %164 = vector.load %arg16[%c1_142, %c384_143] : memref<8x512xf32, #tpu.memory_space<vmem>>, vector<1x64xf32>
    tpu.vector_store %arg16[%c1_142, %c384_143], %163 {strides = array<i32>} : memref<8x512xf32, #tpu.memory_space<vmem>>, vector<1x64xf32>,
    %165 = vector.extract_strided_slice %132 {offsets = [7, 64], sizes = [1, 64], strides = [1, 1]} : vector<8x128xf32> to vector<1x64xf32>
    %c1_144 = arith.constant 1 : index
    %c448_145 = arith.constant 448 : index
    %166 = vector.load %arg16[%c1_144, %c448_145] : memref<8x512xf32, #tpu.memory_space<vmem>>, vector<1x64xf32>
    tpu.vector_store %arg16[%c1_144, %c448_145], %165 {strides = array<i32>} : memref<8x512xf32, #tpu.memory_space<vmem>>, vector<1x64xf32>,
    %c0_146 = arith.constant 0 : index
    %c0_147 = arith.constant 0 : index
    %167 = vector.load %arg16[%c0_146, %c0_147] : memref<8x512xf32, #tpu.memory_space<vmem>>, vector<8x512xf32>
    %168 = arith.truncf %167 : vector<8x512xf32> to vector<8x512xbf16>
    %c0_148 = arith.constant 0 : index
    %c0_149 = arith.constant 0 : index
    %169 = vector.load %arg7[%c0_148, %c0_149] : memref<512x32xbf16, #tpu.memory_space<vmem>>, vector<512x32xbf16>
    %cst_150 = arith.constant dense<0.000000e+00> : vector<8x32xf32>
    %170 = tpu.matmul %168, %169, %cst_150 {dimension_numbers = #tpu.dot_dimension_numbers<[1], [0], [0], [1], [0, 0, 1, 1], [], []>} : vector<8x512xbf16>, vector<512x32xbf16>, vector<8x32xf32> -> vector<8x32xf32>
    %c0_151 = arith.constant 0 : index
    %c0_152 = arith.constant 0 : index
    %171 = vector.load %arg8[%c0_151, %c0_152] : memref<1x32xf32, #tpu.memory_space<vmem>>, vector<1x32xf32>
    %172 = vector.broadcast %171 : vector<1x32xf32> to vector<8x32xf32>
    %173 = arith.addf %170, %172 : vector<8x32xf32>
    %174 = arith.truncf %173 : vector<8x32xf32> to vector<8x32xbf16>
    %c0_153 = arith.constant 0 : index
    %c0_154 = arith.constant 0 : index
    %175 = vector.load %arg9[%c0_153, %c0_154] : memref<32x16xbf16, #tpu.memory_space<vmem>>, vector<32x16xbf16>
    %cst_155 = arith.constant dense<0.000000e+00> : vector<8x16xf32>
    %176 = tpu.matmul %174, %175, %cst_155 {dimension_numbers = #tpu.dot_dimension_numbers<[1], [0], [0], [1], [0, 0, 1, 1], [], []>} : vector<8x32xbf16>, vector<32x16xbf16>, vector<8x16xf32> -> vector<8x16xf32>
    %c0_156 = arith.constant 0 : index
    %c0_157 = arith.constant 0 : index
    %177 = vector.load %arg10[%c0_156, %c0_157] : memref<1x16xf32, #tpu.memory_space<vmem>>, vector<1x16xf32>
    %178 = vector.broadcast %177 : vector<1x16xf32> to vector<8x16xf32>
    %179 = arith.addf %176, %178 : vector<8x16xf32>
    %180 = arith.truncf %179 : vector<8x16xf32> to vector<8x16xbf16>
    %c0_158 = arith.constant 0 : index
    %c0_159 = arith.constant 0 : index
    %181 = vector.load %arg11[%c0_158, %c0_159] : memref<16x26xbf16, #tpu.memory_space<vmem>>, vector<16x26xbf16>
    %cst_160 = arith.constant dense<0.000000e+00> : vector<8x26xf32>
    %182 = tpu.matmul %180, %181, %cst_160 {dimension_numbers = #tpu.dot_dimension_numbers<[1], [0], [0], [1], [0, 0, 1, 1], [], []>} : vector<8x16xbf16>, vector<16x26xbf16>, vector<8x26xf32> -> vector<8x26xf32>
    %c0_161 = arith.constant 0 : index
    %c0_162 = arith.constant 0 : index
    %183 = vector.load %arg12[%c0_161, %c0_162] : memref<1x26xf32, #tpu.memory_space<vmem>>, vector<1x26xf32>
    %184 = vector.broadcast %183 : vector<1x26xf32> to vector<8x26xf32>
    %185 = arith.addf %182, %184 : vector<8x26xf32>
    %cst_163 = arith.constant dense<0xFF800000> : vector<8xf32>
    %186 = vector.multi_reduction <maximumf>, %185, %cst_163 [1] : vector<8x26xf32> to vector<8xf32>
    %187 = vector.shape_cast %186 : vector<8xf32> to vector<8x1xf32>
    %188 = vector.broadcast %187 : vector<8x1xf32> to vector<8x26xf32>
    %189 = arith.subf %185, %188 : vector<8x26xf32>
    %190 = math.exp %189 : vector<8x26xf32>
    %cst_164 = arith.constant dense<0.000000e+00> : vector<8xf32>
    %191 = vector.multi_reduction <add>, %190, %cst_164 [1] : vector<8x26xf32> to vector<8xf32>
    %192 = vector.shape_cast %191 : vector<8xf32> to vector<8x1xf32>
    %193 = vector.broadcast %192 : vector<8x1xf32> to vector<8x26xf32>
    %194 = arith.divf %190, %193 : vector<8x26xf32>
    %195 = vector.extract_strided_slice %194 {offsets = [0, 0], sizes = [2, 26], strides = [1, 1]} : vector<8x26xf32> to vector<2x26xf32>
    %c0_165 = arith.constant 0 : index
    %c0_166 = arith.constant 0 : index
    %196 = vector.load %arg13[%c0_165, %c0_166] : memref<2x26xf32, #tpu.memory_space<vmem>>, vector<2x26xf32>
    tpu.vector_store %arg13[%c0_165, %c0_166], %195 {strides = array<i32>} : memref<2x26xf32, #tpu.memory_space<vmem>>, vector<2x26xf32>,
    return
  }
}

</mosaic_0001>

<bundles_post_ra>
// kernel: baseline_cnn_forward.1
= control target key start
LH: loop header
LB: loop body
LE: loop exit
PB: predicated region body
PF: predicated region fallthrough
CT: control target
= control target key end

     0   :  { %s4754_s16 = smov 127   ;;  %v4755_v10 = vmov 0   ;;  %v4756_v11 = vmov 0.0   ;;  %s4758_s21 = smov 110   ;;  %s5813_s0 = inlined_call_operand.vmem [shape: f32[8,768], index: 0, kind: input, shape index: {}]   ;;  %s5814_s1 = inlined_call_operand.vmem [shape: f32[1,640], index: 1, kind: input, shape index: {}]   ;;  %s5815_s2 = inlined_call_operand.vmem [shape: bf16[592,128], index: 2, kind: input, shape index: {}]   ;;  %s5816_s3 = inlined_call_operand.vmem [shape: bf16[9,8,8], index: 3, kind: input, shape index: {}]   ;;  %s5817_s4 = inlined_call_operand.vmem [shape: f32[8,1], index: 4, kind: input, shape index: {}]   ;;  %s5818_s5 = inlined_call_operand.vmem [shape: bf16[9,8,8], index: 5, kind: input, shape index: {}]   ;;  %s5819_s6 = inlined_call_operand.vmem [shape: f32[8,1], index: 6, kind: input, shape index: {}]   ;;  %s5820_s7 = inlined_call_operand.vmem [shape: bf16[512,32], index: 7, kind: input, shape index: {}]   ;;  %s5821_s8 = inlined_call_operand.vmem [shape: f32[1,32], index: 8, kind: input, shape index: {}]   ;;  %s5822_s9 = inlined_call_operand.vmem [shape: bf16[32,16], index: 9, kind: input, shape index: {}]   ;;  %s5823_s10 = inlined_call_operand.vmem [shape: f32[1,16], index: 10, kind: input, shape index: {}]   ;;  %s5824_s11 = inlined_call_operand.vmem [shape: bf16[16,26], index: 11, kind: input, shape index: {}]   ;;  %s5825_s12 = inlined_call_operand.vmem [shape: f32[1,26], index: 12, kind: input, shape index: {}]   ;;  %s5826_s13 = inlined_call_operand.hbm [shape: f32[2,26], index: 13, kind: output, shape index: {}]  }
   0x1   :  { %v59_v0 = vld [vmem:[%s5813_s0 + $0x10] sm:$0xff]  ;;  %v57_v1 = vld [vmem:[%s5813_s0] sm:$0xff]  ;;  %v60_v2 = vld [vmem:[%s5813_s0 + $0x18] sm:$0xff]  ;;  %147 = vmatprep.mubr.bf16.mxu0 %v4755_v10  ;;  %1575 = vst [vmem:[#allocation2] sm:$0xff] %v4756_v11  ;;  %188 = vmatprep.mubr.bf16.mxu1 %v4755_v10  ;;  %s4759_s22 = smov 109   ;;  %s4760_s23 = smov 108  }
   0x2   :  { %v4847_v3 = vpack.c.bf16 %v59_v0, %v59_v0  ;;  %v4849_v4 = vpack.c.bf16 %v57_v1, %v57_v1  ;;  %v58_v5 = vld [vmem:[%s5813_s0 + $0x8] sm:$0xff]  ;;  %v4858_v6 = vpack.c.bf16 %v60_v2, %v60_v2  ;;  %v61_v9 = vld [vmem:[%s5813_s0 + $0x20] sm:$0xff]  ;;  %1580 = vst [vmem:[#allocation2 + $0x28] sm:$0xff] %v4756_v11  ;;  %3596 = vst [vmem:[#allocation4] sm:$0xff] %v4756_v11  ;;  %4633 = vset.pattern.permute.xlu0 %v4755_v10 }
   0x3   :  { %v4860_v7 = vpack.c.bf16 %v58_v5, %v58_v5  ;;  %v62_v8 = vld [vmem:[%s5813_s0 + $0x28] sm:$0xff]  ;;  %3597 = vst [vmem:[#allocation4 + $0x8] sm:$0xff] %v4756_v11  ;;  %3598 = vst [vmem:[#allocation4 + $0x10] sm:$0xff] %v4756_v11  ;;  %4634 = vset.pattern.permute.xlu1 %v4755_v10  ;;  %v4882_v13 = vpack.c.bf16 %v61_v9, %v61_v9  ;;  %s4757_s0 = smov 126  }
   0x4   :  { %81 = vrot.lane.b32.xlu1 %v4847_v3, %s4754_s16  ;;  %77 = vrot.lane.b32.xlu0 %v4849_v4, %s4754_s16  ;;  %3599 = vst [vmem:[#allocation4 + $0x18] sm:$0xff] %v4756_v11  ;;  %v68_v12 = vpack.c.bf16 %v62_v8, %v62_v8 }
   0x8   :  { %83 = vrot.lane.b32.xlu1 %v4858_v6, %s4754_s16  ;;  %79 = vrot.lane.b32.xlu0 %v4860_v7, %s4754_s16 }
   0xc   :  { %87 = vrot.lane.b32.xlu1 %v68_v12, %s4754_s16  ;;  %85 = vrot.lane.b32.xlu0 %v4882_v13, %s4754_s16 }
  0x10   :  { %379 = vrot.lane.b32.xlu0 %v4849_v4, %s4757_s0  ;;  %381 = vrot.lane.b32.xlu1 %v4860_v7, %s4757_s0 }
  0x14   :  { %383 = vrot.lane.b32.xlu0 %v4847_v3, %s4757_s0  ;;  %385 = vrot.lane.b32.xlu1 %v4858_v6, %s4757_s0 }
  0x18   :  { %387 = vrot.lane.b32.xlu0 %v4882_v13, %s4757_s0  ;;  %389 = vrot.lane.b32.xlu1 %v68_v12, %s4757_s0 }
  0x1c   :  { %544 = vrot.lane.b32.xlu0 %v4849_v4, %s4758_s21  ;;  %546 = vrot.lane.b32.xlu1 %v4860_v7, %s4758_s21 }
  0x20   :  { %548 = vrot.lane.b32.xlu0 %v4847_v3, %s4758_s21  ;;  %550 = vrot.lane.b32.xlu1 %v4858_v6, %s4758_s21 }
  0x24   :  { %552 = vrot.lane.b32.xlu0 %v4882_v13, %s4758_s21  ;;  %554 = vrot.lane.b32.xlu1 %v68_v12, %s4758_s21 }
  0x28   :  { %709 = vrot.lane.b32.xlu0 %v4849_v4, %s4759_s22  ;;  %711 = vrot.lane.b32.xlu1 %v4860_v7, %s4759_s22 }
  0x2c   :  { %713 = vrot.lane.b32.xlu0 %v4847_v3, %s4759_s22  ;;  %715 = vrot.lane.b32.xlu1 %v4858_v6, %s4759_s22 }
  0x30   :  { %717 = vrot.lane.b32.xlu0 %v4882_v13, %s4759_s22  ;;  %719 = vrot.lane.b32.xlu1 %v68_v12, %s4759_s22 }
  0x34   :  { %874 = vrot.lane.b32.xlu0 %v4849_v4, %s4760_s23  ;;  %876 = vrot.lane.b32.xlu1 %v4860_v7, %s4760_s23 }
  0x38   :  { %878 = vrot.lane.b32.xlu0 %v4847_v3, %s4760_s23  ;;  %880 = vrot.lane.b32.xlu1 %v4858_v6, %s4760_s23 }
  0x3c   :  { %882 = vrot.lane.b32.xlu0 %v4882_v13, %s4760_s23  ;;  %884 = vrot.lane.b32.xlu1 %v68_v12, %s4760_s23 }
  0x3d   :  { %18 = vsyncpa [#allocation6], 0  ;;  %s4761_s24 = smov 92   ;;  %s4762_s25 = smov 91   ;;  %v1532_v14 = vld [vmem:[%s5817_s4] sm:$0xff]  ;;  %vm89_vm0 = vcmask 1039360  }
  0x3e   :  { %s4763_s26 = smov 90   ;;  %vm99_vm1 = vcmask 1043456   ;;  %v4164_v22 = vld [vmem:[%s5816_s3 + $0x4] sm:$0xf]  ;;  %vm95_vm2 = vcmask 64512   ;;  %vm4764_vm3 = vmmov 0  }
  0x3f   :  { %v241_v30 = vsel %vm99_vm1, %v4849_v4, 0  ;;  %vm391_vm4 = vcmask 1031168   ;;  %v247_v33 = vsel %vm99_vm1, %v4847_v3, 0  ;;  %v56_v37 = vld [vmem:[%s5816_s3] sm:$0xf]  ;;  %v253_v38 = vsel %vm99_vm1, %v4882_v13, 0 }
  0x40   :  { %1039 = vrot.lane.b32.xlu0 %v4849_v4, %s4761_s24  ;;  %1041 = vrot.lane.b32.xlu1 %v4860_v7, %s4761_s24  ;;  %vm556_vm5 = vcmask 900096   ;;  %v4175_v52 = vld [vmem:[%s5816_s3 + $0x8] sm:$0xf]  ;;  %vm721_vm6 = vcmask 891904   ;;  %vm886_vm7 = vcmask 883712   ;;  %vm1051_vm8 = vcmask 752640  }
  0x41   :  { %vm1216_vm9 = vcmask 744448   ;;  %vm1381_vm10 = vcmask 736256   ;;  %vm1607_vm11 = vcmask 1047704   ;;  %vm1596_vm12 = vcmask 154624   ;;  %s4766_s14 = smov 64  }
  0x42   :  { %vm3472_vm13 = vcmask 654336   ;;  %vm3600_vm14 = vcmask 516096   ;;  %vm3607_vm15 = vcmask 1040896  }
  0x44   :  { %1043 = vrot.lane.b32.xlu0 %v4847_v3, %s4761_s24  ;;  %1045 = vrot.lane.b32.xlu1 %v4858_v6, %s4761_s24 }
  0x48   :  { %1047 = vrot.lane.b32.xlu0 %v4882_v13, %s4761_s24  ;;  %1049 = vrot.lane.b32.xlu1 %v68_v12, %s4761_s24 }
  0x4c   :  { %1204 = vrot.lane.b32.xlu0 %v4849_v4, %s4762_s25  ;;  %1206 = vrot.lane.b32.xlu1 %v4860_v7, %s4762_s25 }
  0x50   :  { %1208 = vrot.lane.b32.xlu0 %v4847_v3, %s4762_s25  ;;  %1210 = vrot.lane.b32.xlu1 %v4858_v6, %s4762_s25 }
  0x54   :  { %1212 = vrot.lane.b32.xlu0 %v4882_v13, %s4762_s25  ;;  %1214 = vrot.lane.b32.xlu1 %v68_v12, %s4762_s25 }
  0x58   :  { %1369 = vrot.lane.b32.xlu0 %v4849_v4, %s4763_s26  ;;  %1371 = vrot.lane.b32.xlu1 %v4860_v7, %s4763_s26 }
  0x5c   :  { %1373 = vrot.lane.b32.xlu0 %v4847_v3, %s4763_s26  ;;  %1375 = vrot.lane.b32.xlu1 %v4858_v6, %s4763_s26  ;;  %v4181_v3 = vld [vmem:[%s5816_s3 + $0xc] sm:$0xf] }
  0x60   :  { %1377 = vrot.lane.b32.xlu0 %v4882_v13, %s4763_s26  ;;  %1379 = vrot.lane.b32.xlu1 %v68_v12, %s4763_s26 }
  0x64   :  { %1535 = vperm.xlu0 %4633, %v1532_v14  }
  0x76   :  { %v82_v15 = vpop.permute.xlu1 %81  ;;  %v78_v16 = vpop.permute.xlu0 %77 }
  0x7a   :  { %v84_v17 = vpop.permute.xlu1 %83  ;;  %v80_v18 = vpop.permute.xlu0 %79 }
  0x7b   :  { %v91_v19 = vsel %vm89_vm0, %v80_v18, %v82_v15  ;;  %v90_v20 = vsel %vm89_vm0, %v78_v16, %v80_v18  ;;  %v92_v23 = vsel %vm89_vm0, %v82_v15, %v84_v17 }
  0x7c   :  { %4165 = vmatprep.subr.msk.bf16.mxu0 %vm99_vm1, %v91_v19  ;;  %v101_v21 = vsel %vm99_vm1, %v90_v20, 0  ;;  %v107_v28 = vsel %vm99_vm1, %v92_v23, 0  ;;  %v4187_v20 = vld [vmem:[%s5816_s3 + $0x10] sm:$0xf] }
  0x7d   :  { %130 = vmatpush1.bf16.msra.mxu0 %v101_v21 }
  0x7e   :  { %v88_v24 = vpop.permute.xlu1 %87  ;;  %v86_v25 = vpop.permute.xlu0 %85  ;;  %4483 = vmatprep.subr.bf16.mxu0 %v4756_v11 }
  0x7f   :  { %v94_v26 = vsel %vm89_vm0, %v86_v25, %v88_v24  ;;  %v93_v27 = vsel %vm89_vm0, %v84_v17, %v86_v25 }
  0x80   :  { %4166 = vmatmul.mubr.msk.bf16.vlgmr.msra.gmra.mxu0 %vm95_vm2, %v4164_v22  ;;  %4167 = vmatprep.subr.msk.bf16.mxu1 %vm99_vm1, %v93_v27  ;;  %v113_v29 = vsel %vm99_vm1, %v94_v26, 0 }
  0x81   :  { %171 = vmatpush1.bf16.msra.mxu1 %v107_v28  ;;  %4484 = vmatpush3.bf16.msra.mxu0 %v113_v29 }
  0x82   :  { %4485 = vmatprep.mubr.msk.bf16.mxu0 %vm4764_vm3, %v4756_v11  ;;  %4170 = vmatprep.subr.msk.bf16.mxu1 %vm99_vm1, %v4860_v7  ;;  %v380_v31 = vpop.permute.xlu0 %379  ;;  %v382_v32 = vpop.permute.xlu1 %381 }
  0x83   :  { %4172 = vmatprep.subr.msk.bf16.mxu0 %vm99_vm1, %v4858_v6  ;;  %v392_v41 = vsel %vm391_vm4, %v380_v31, %v382_v32 }
  0x84   :  { %4168 = vmatmul.mubr.msk.bf16.vlgmr.msra.gmra.mxu1 %vm95_vm2, %v4164_v22  ;;  %v401_v43 = vsel %vm99_vm1, %v392_v41, 0 }
  0x85   :  { %270 = vmatpush1.bf16.msra.mxu1 %v241_v30  ;;  %287 = vmatprep.mubr.bf16.mxu1 %v4755_v10 }
  0x86   :  { %v384_v34 = vpop.permute.xlu0 %383  ;;  %4489 = vmatprep.subr.bf16.mxu1 %v4756_v11  ;;  %v386_v35 = vpop.permute.xlu1 %385 }
  0x87   :  { %v393_v36 = vsel %vm391_vm4, %v382_v32, %v384_v34  ;;  %v394_v46 = vsel %vm391_vm4, %v384_v34, %v386_v35 }
  0x88   :  { %4486 = vmatmul.mubr.msk.bf16.vlgmr.msra.gmra.mxu0 %vm95_vm2, %v4164_v22  ;;  %v407_v47 = vsel %vm99_vm1, %v394_v46, 0 }
  0x89   :  { %311 = vmatpush1.bf16.msra.mxu0 %v247_v33  ;;  %328 = vmatprep.mubr.bf16.mxu0 %v4755_v10 }
  0x8a   :  { %4176 = vmatprep.subr.msk.bf16.mxu0 %vm99_vm1, %v393_v36  ;;  %v388_v39 = vpop.permute.xlu0 %387  ;;  %v390_v40 = vpop.permute.xlu1 %389 }
  0x8b   :  { %v395_v42 = vsel %vm391_vm4, %v386_v35, %v388_v39  ;;  %v396_v50 = vsel %vm391_vm4, %v388_v39, %v390_v40  ;;  %v4193_v35 = vld [vmem:[%s5816_s3 + $0x14] sm:$0xf] }
  0x8c   :  { %4171 = vmatmul.mubr.msk.bf16.vlgmr.msra.gmra.mxu1 %vm95_vm2, %v56_v37  ;;  %v413_v53 = vsel %vm99_vm1, %v396_v50, 0  ;;  %v4199_v50 = vld [vmem:[%s5816_s3 + $0x18] sm:$0xf] }
  0x8d   :  { %4490 = vmatpush3.bf16.msra.mxu1 %v253_v38  ;;  %4491 = vmatprep.mubr.msk.bf16.mxu1 %vm4764_vm3, %v4756_v11 }
  0x8e   :  { %4178 = vmatprep.subr.msk.bf16.mxu1 %vm99_vm1, %v395_v42  ;;  %v545_v44 = vpop.permute.xlu0 %544  ;;  %v547_v45 = vpop.permute.xlu1 %546 }
  0x8f   :  { %v557_v56 = vsel %vm556_vm5, %v545_v44, %v547_v45 }
  0x90   :  { %4173 = vmatmul.mubr.msk.bf16.vlgmr.msra.gmra.mxu0 %vm95_vm2, %v56_v37  ;;  %v566_v58 = vsel %vm99_vm1, %v557_v56, 0 }
  0x91   :  { %430 = vmatpush1.bf16.msra.mxu0 %v401_v43  ;;  %447 = vmatprep.mubr.bf16.mxu0 %v4755_v10 }
  0x92   :  { %4495 = vmatprep.subr.bf16.mxu0 %v4756_v11  ;;  %v549_v48 = vpop.permute.xlu0 %548  ;;  %v551_v49 = vpop.permute.xlu1 %550 }
  0x93   :  { %v558_v51 = vsel %vm556_vm5, %v547_v45, %v549_v48  ;;  %v559_v61 = vsel %vm556_vm5, %v549_v48, %v551_v49 }
  0x94   :  { %4492 = vmatmul.mubr.msk.bf16.vlgmr.msra.gmra.mxu1 %vm95_vm2, %v56_v37  ;;  %v572_v62 = vsel %vm99_vm1, %v559_v61, 0 }
  0x95   :  { %471 = vmatpush1.bf16.msra.mxu1 %v407_v47  ;;  %488 = vmatprep.mubr.bf16.mxu1 %v4755_v10 }
  0x96   :  { %4182 = vmatprep.subr.msk.bf16.mxu1 %vm99_vm1, %v558_v51  ;;  %v553_v54 = vpop.permute.xlu0 %552  ;;  %v555_v55 = vpop.permute.xlu1 %554 }
  0x97   :  { %v560_v57 = vsel %vm556_vm5, %v551_v49, %v553_v54  ;;  %v561_v1 = vsel %vm556_vm5, %v553_v54, %v555_v55 }
  0x98   :  { %4177 = vmatmul.mubr.msk.bf16.vlgmr.msra.gmra.mxu0 %vm95_vm2, %v4175_v52  ;;  %v578_v4 = vsel %vm99_vm1, %v561_v1, 0  ;;  %v4205_v1 = vld [vmem:[%s5816_s3 + $0x1c] sm:$0xf] }
  0x99   :  { %4496 = vmatpush3.bf16.msra.mxu0 %v413_v53  ;;  %4497 = vmatprep.mubr.msk.bf16.mxu0 %vm4764_vm3, %v4756_v11 }
  0x9a   :  { %4184 = vmatprep.subr.msk.bf16.mxu0 %vm99_vm1, %v560_v57  ;;  %v710_v59 = vpop.permute.xlu0 %709  ;;  %v712_v60 = vpop.permute.xlu1 %711 }
  0x9b   :  { %v722_v7 = vsel %vm721_vm6, %v710_v59, %v712_v60 }
  0x9c   :  { %4179 = vmatmul.mubr.msk.bf16.vlgmr.msra.gmra.mxu1 %vm95_vm2, %v4175_v52  ;;  %v731_v9 = vsel %vm99_vm1, %v722_v7, 0 }
  0x9d   :  { %595 = vmatpush1.bf16.msra.mxu1 %v566_v58  ;;  %612 = vmatprep.mubr.bf16.mxu1 %v4755_v10 }
  0x9e   :  { %4501 = vmatprep.subr.bf16.mxu1 %v4756_v11  ;;  %v714_v63 = vpop.permute.xlu0 %713  ;;  %v716_v0 = vpop.permute.xlu1 %715 }
  0x9f   :  { %v723_v2 = vsel %vm721_vm6, %v712_v60, %v714_v63  ;;  %v724_v14 = vsel %vm721_vm6, %v714_v63, %v716_v0 }
  0xa0   :  { %4498 = vmatmul.mubr.msk.bf16.vlgmr.msra.gmra.mxu0 %vm95_vm2, %v4175_v52  ;;  %v737_v15 = vsel %vm99_vm1, %v724_v14, 0 }
  0xa1   :  { %636 = vmatpush1.bf16.msra.mxu0 %v572_v62  ;;  %653 = vmatprep.mubr.bf16.mxu0 %v4755_v10 }
  0xa2   :  { %4188 = vmatprep.subr.msk.bf16.mxu0 %vm99_vm1, %v723_v2  ;;  %v718_v5 = vpop.permute.xlu0 %717  ;;  %v720_v6 = vpop.permute.xlu1 %719 }
  0xa3   :  { %v725_v8 = vsel %vm721_vm6, %v716_v0, %v718_v5  ;;  %v726_v18 = vsel %vm721_vm6, %v718_v5, %v720_v6 }
  0xa4   :  { %4183 = vmatmul.mubr.msk.bf16.vlgmr.msra.gmra.mxu1 %vm95_vm2, %v4181_v3  ;;  %v743_v21 = vsel %vm99_vm1, %v726_v18, 0 }
  0xa5   :  { %4502 = vmatpush3.bf16.msra.mxu1 %v578_v4  ;;  %4503 = vmatprep.mubr.msk.bf16.mxu1 %vm4764_vm3, %v4756_v11 }
  0xa6   :  { %4190 = vmatprep.subr.msk.bf16.mxu1 %vm99_vm1, %v725_v8  ;;  %v875_v12 = vpop.permute.xlu0 %874  ;;  %v877_v13 = vpop.permute.xlu1 %876 }
  0xa7   :  { %v887_v24 = vsel %vm886_vm7, %v875_v12, %v877_v13 }
  0xa8   :  { %4185 = vmatmul.mubr.msk.bf16.vlgmr.msra.gmra.mxu0 %vm95_vm2, %v4181_v3  ;;  %v896_v26 = vsel %vm99_vm1, %v887_v24, 0 }
  0xa9   :  { %760 = vmatpush1.bf16.msra.mxu0 %v731_v9  ;;  %777 = vmatprep.mubr.bf16.mxu0 %v4755_v10 }
  0xaa   :  { %4507 = vmatprep.subr.bf16.mxu0 %v4756_v11  ;;  %v879_v16 = vpop.permute.xlu0 %878  ;;  %v881_v17 = vpop.permute.xlu1 %880 }
  0xab   :  { %v888_v19 = vsel %vm886_vm7, %v877_v13, %v879_v16  ;;  %v889_v29 = vsel %vm886_vm7, %v879_v16, %v881_v17  ;;  %v4211_v13 = vld [vmem:[%s5816_s3 + $0x20] sm:$0xf] }
  0xac   :  { %4504 = vmatmul.mubr.msk.bf16.vlgmr.msra.gmra.mxu1 %vm95_vm2, %v4181_v3  ;;  %v902_v30 = vsel %vm99_vm1, %v889_v29, 0 }
  0xad   :  { %801 = vmatpush1.bf16.msra.mxu1 %v737_v15  ;;  %818 = vmatprep.mubr.bf16.mxu1 %v4755_v10 }
  0xae   :  { %4194 = vmatprep.subr.msk.bf16.mxu1 %vm99_vm1, %v888_v19  ;;  %v883_v22 = vpop.permute.xlu0 %882  ;;  %v885_v23 = vpop.permute.xlu1 %884 }
  0xaf   :  { %v890_v25 = vsel %vm886_vm7, %v881_v17, %v883_v22  ;;  %v891_v33 = vsel %vm886_vm7, %v883_v22, %v885_v23 }
  0xb0   :  { %4189 = vmatmul.mubr.msk.bf16.vlgmr.msra.gmra.mxu0 %vm95_vm2, %v4187_v20  ;;  %v908_v36 = vsel %vm99_vm1, %v891_v33, 0 }
  0xb1   :  { %4508 = vmatpush3.bf16.msra.mxu0 %v743_v21  ;;  %4509 = vmatprep.mubr.msk.bf16.mxu0 %vm4764_vm3, %v4756_v11 }
  0xb2   :  { %4196 = vmatprep.subr.msk.bf16.mxu0 %vm99_vm1, %v890_v25  ;;  %v1040_v27 = vpop.permute.xlu0 %1039  ;;  %v1042_v28 = vpop.permute.xlu1 %1041 }
  0xb3   :  { %v1052_v39 = vsel %vm1051_vm8, %v1040_v27, %v1042_v28 }
  0xb4   :  { %4191 = vmatmul.mubr.msk.bf16.vlgmr.msra.gmra.mxu1 %vm95_vm2, %v4187_v20  ;;  %v1061_v41 = vsel %vm99_vm1, %v1052_v39, 0 }
  0xb5   :  { %925 = vmatpush1.bf16.msra.mxu1 %v896_v26  ;;  %942 = vmatprep.mubr.bf16.mxu1 %v4755_v10 }
  0xb6   :  { %4513 = vmatprep.subr.bf16.mxu1 %v4756_v11  ;;  %v1044_v31 = vpop.permute.xlu0 %1043  ;;  %v1046_v32 = vpop.permute.xlu1 %1045 }
  0xb7   :  { %v1053_v34 = vsel %vm1051_vm8, %v1042_v28, %v1044_v31  ;;  %v1054_v44 = vsel %vm1051_vm8, %v1044_v31, %v1046_v32 }
  0xb8   :  { %4510 = vmatmul.mubr.msk.bf16.vlgmr.msra.gmra.mxu0 %vm95_vm2, %v4187_v20  ;;  %v1067_v45 = vsel %vm99_vm1, %v1054_v44, 0 }
  0xb9   :  { %966 = vmatpush1.bf16.msra.mxu0 %v902_v30  ;;  %983 = vmatprep.mubr.bf16.mxu0 %v4755_v10 }
  0xba   :  { %4200 = vmatprep.subr.msk.bf16.mxu0 %vm99_vm1, %v1053_v34  ;;  %v1048_v37 = vpop.permute.xlu0 %1047  ;;  %v1050_v38 = vpop.permute.xlu1 %1049 }
  0xbb   :  { %v1055_v40 = vsel %vm1051_vm8, %v1046_v32, %v1048_v37  ;;  %v1056_v48 = vsel %vm1051_vm8, %v1048_v37, %v1050_v38 }
  0xbc   :  { %4195 = vmatmul.mubr.msk.bf16.vlgmr.msra.gmra.mxu1 %vm95_vm2, %v4193_v35  ;;  %v1073_v51 = vsel %vm99_vm1, %v1056_v48, 0 }
  0xbd   :  { %4514 = vmatpush3.bf16.msra.mxu1 %v908_v36  ;;  %4515 = vmatprep.mubr.msk.bf16.mxu1 %vm4764_vm3, %v4756_v11 }
  0xbe   :  { %4202 = vmatprep.subr.msk.bf16.mxu1 %vm99_vm1, %v1055_v40  ;;  %v1205_v42 = vpop.permute.xlu0 %1204  ;;  %v1207_v43 = vpop.permute.xlu1 %1206 }
  0xbf   :  { %v1217_v54 = vsel %vm1216_vm9, %v1205_v42, %v1207_v43 }
  0xc0   :  { %4197 = vmatmul.mubr.msk.bf16.vlgmr.msra.gmra.mxu0 %vm95_vm2, %v4193_v35  ;;  %v1226_v56 = vsel %vm99_vm1, %v1217_v54, 0 }
  0xc1   :  { %1090 = vmatpush1.bf16.msra.mxu0 %v1061_v41  ;;  %1107 = vmatprep.mubr.bf16.mxu0 %v4755_v10 }
  0xc2   :  { %4519 = vmatprep.subr.bf16.mxu0 %v4756_v11  ;;  %v1209_v46 = vpop.permute.xlu0 %1208  ;;  %v1211_v47 = vpop.permute.xlu1 %1210 }
  0xc3   :  { %v1218_v49 = vsel %vm1216_vm9, %v1207_v43, %v1209_v46  ;;  %v1219_v59 = vsel %vm1216_vm9, %v1209_v46, %v1211_v47 }
  0xc4   :  { %4516 = vmatmul.mubr.msk.bf16.vlgmr.msra.gmra.mxu1 %vm95_vm2, %v4193_v35  ;;  %v1232_v60 = vsel %vm99_vm1, %v1219_v59, 0 }
  0xc5   :  { %1131 = vmatpush1.bf16.msra.mxu1 %v1067_v45  ;;  %1148 = vmatprep.mubr.bf16.mxu1 %v4755_v10 }
  0xc6   :  { %4206 = vmatprep.subr.msk.bf16.mxu1 %vm99_vm1, %v1218_v49  ;;  %v1213_v52 = vpop.permute.xlu0 %1212  ;;  %v1215_v53 = vpop.permute.xlu1 %1214 }
  0xc7   :  { %v1220_v55 = vsel %vm1216_vm9, %v1211_v47, %v1213_v52  ;;  %v1221_v62 = vsel %vm1216_vm9, %v1213_v52, %v1215_v53 }
  0xc8   :  { %4201 = vmatmul.mubr.msk.bf16.vlgmr.msra.gmra.mxu0 %vm95_vm2, %v4199_v50  ;;  %v1238_v2 = vsel %vm99_vm1, %v1221_v62, 0 }
  0xc9   :  { %4520 = vmatpush3.bf16.msra.mxu0 %v1073_v51  ;;  %4521 = vmatprep.mubr.msk.bf16.mxu0 %vm4764_vm3, %v4756_v11 }
  0xca   :  { %4208 = vmatprep.subr.msk.bf16.mxu0 %vm99_vm1, %v1220_v55  ;;  %v1370_v57 = vpop.permute.xlu0 %1369  ;;  %v1372_v58 = vpop.permute.xlu1 %1371 }
  0xcb   :  { %v1382_v4 = vsel %vm1381_vm10, %v1370_v57, %v1372_v58 }
  0xcc   :  { %4203 = vmatmul.mubr.msk.bf16.vlgmr.msra.gmra.mxu1 %vm95_vm2, %v4199_v50  ;;  %v1391_v6 = vsel %vm99_vm1, %v1382_v4, 0 }
  0xcd   :  { %1255 = vmatpush1.bf16.msra.mxu1 %v1226_v56  ;;  %1272 = vmatprep.mubr.bf16.mxu1 %v4755_v10 }
  0xce   :  { %4525 = vmatprep.subr.bf16.mxu1 %v4756_v11  ;;  %v1374_v61 = vpop.permute.xlu0 %1373  ;;  %v1376_v0 = vpop.permute.xlu1 %1375 }
  0xcf   :  { %v1383_v63 = vsel %vm1381_vm10, %v1372_v58, %v1374_v61  ;;  %v1384_v7 = vsel %vm1381_vm10, %v1374_v61, %v1376_v0 }
  0xd0   :  { %4522 = vmatmul.mubr.msk.bf16.vlgmr.msra.gmra.mxu0 %vm95_vm2, %v4199_v50  ;;  %v1397_v9 = vsel %vm99_vm1, %v1384_v7, 0 }
  0xd1   :  { %1296 = vmatpush1.bf16.msra.mxu0 %v1232_v60  ;;  %1313 = vmatprep.mubr.bf16.mxu0 %v4755_v10 }
  0xd2   :  { %4212 = vmatprep.subr.msk.bf16.mxu0 %vm99_vm1, %v1383_v63  ;;  %v1378_v3 = vpop.permute.xlu0 %1377  ;;  %v1380_v8 = vpop.permute.xlu1 %1379 }
  0xd3   :  { %v1385_v5 = vsel %vm1381_vm10, %v1376_v0, %v1378_v3  ;;  %v1386_v12 = vsel %vm1381_vm10, %v1378_v3, %v1380_v8 }
  0xd4   :  { %4207 = vmatmul.mubr.msk.bf16.vlgmr.msra.gmra.mxu1 %vm95_vm2, %v4205_v1  ;;  %v1403_v14 = vsel %vm99_vm1, %v1386_v12, 0 }
  0xd5   :  { %4526 = vmatpush3.bf16.msra.mxu1 %v1238_v2  ;;  %4527 = vmatprep.mubr.msk.bf16.mxu1 %vm4764_vm3, %v4756_v11 }
  0xd6   :  { %4214 = vmatprep.subr.msk.bf16.mxu1 %vm99_vm1, %v1385_v5 }
  0xd8   :  { %4209 = vmatmul.mubr.msk.bf16.vlgmr.msra.gmra.mxu0 %vm95_vm2, %v4205_v1 }
  0xd9   :  { %1420 = vmatpush1.bf16.msra.mxu0 %v1391_v6  ;;  %1437 = vmatprep.mubr.bf16.mxu0 %v4755_v10 }
  0xda   :  { %4531 = vmatprep.subr.bf16.mxu0 %v4756_v11 }
  0xdc   :  { %4528 = vmatmul.mubr.msk.bf16.vlgmr.msra.gmra.mxu1 %vm95_vm2, %v4205_v1 }
  0xdd   :  { %1461 = vmatpush1.bf16.msra.mxu1 %v1397_v9  ;;  %1478 = vmatprep.mubr.bf16.mxu1 %v4755_v10 }
  0xe0   :  { %4213 = vmatmul.mubr.msk.bf16.vlgmr.msra.gmra.mxu0 %vm95_vm2, %v4211_v13 }
  0xe1   :  { %4532 = vmatpush3.bf16.msra.mxu0 %v1403_v14  ;;  %4533 = vmatprep.mubr.msk.bf16.mxu0 %vm4764_vm3, %v4756_v11 }
  0xe4   :  { %4215 = vmatmul.mubr.msk.bf16.vlgmr.msra.gmra.mxu1 %vm95_vm2, %v4211_v13 }
  0xe5   :  { %1712 = vmatprep.mubr.bf16.mxu1 %v4755_v10 }
  0xe8   :  { %4534 = vmatmul.mubr.msk.bf16.vlgmr.msra.gmra.mxu0 %vm95_vm2, %v4211_v13 }
  0xe9   :  { %1753 = vmatprep.mubr.bf16.mxu0 %v4755_v10 }
 0x140   :  { %v149_v15 = vpop.f32.mrf.mxu0 }
 0x142   :  { %v151_v16 = vpop.f32.mrf.mxu0 }
 0x144   :  { %v153_v17 = vpop.f32.mrf.mxu0  ;;  %v190_v18 = vpop.f32.mrf.mxu1 }
 0x146   :  { %v154_v19 = vpop.f32.mrf.mxu0  ;;  %v192_v20 = vpop.f32.mrf.mxu1 }
 0x148   :  { %v194_v21 = vpop.f32.mrf.mxu1  ;;  %v231_v22 = vpop.f32.mrf.mxu0 }
 0x14a   :  { %v195_v23 = vpop.f32.mrf.mxu1  ;;  %v4487_v24 = vpop.f32.mrf.mxu0 }
 0x14c   :  { %v234_v25 = vpop.f32.mrf.mxu0  ;;  %v289_v11 = vpop.f32.mrf.mxu1 }
 0x14d   :  { %v5156_v26 = vadd.f32 %v289_v11, %v149_v15 }
 0x14e   :  { %v4488_v27 = vpop.f32.mrf.mxu0  ;;  %v291_v28 = vpop.f32.mrf.mxu1 }
 0x14f   :  { %v5158_v29 = vadd.f32 %v291_v28, %v151_v16 }
 0x150   :  { %v293_v30 = vpop.f32.mrf.mxu1  ;;  %v330_v31 = vpop.f32.mrf.mxu0 }
 0x151   :  { %v5160_v32 = vadd.f32 %v330_v31, %v190_v18 }
 0x152   :  { %v294_v33 = vpop.f32.mrf.mxu1  ;;  %v332_v34 = vpop.f32.mrf.mxu0 }
 0x153   :  { %v5162_v35 = vadd.f32 %v332_v34, %v192_v20 }
 0x154   :  { %v334_v36 = vpop.f32.mrf.mxu0  ;;  %v371_v37 = vpop.f32.mrf.mxu1 }
 0x155   :  { %v5164_v38 = vadd.f32 %v371_v37, %v231_v22 }
 0x156   :  { %v335_v39 = vpop.f32.mrf.mxu0  ;;  %v4493_v40 = vpop.f32.mrf.mxu1 }
 0x158   :  { %v374_v41 = vpop.f32.mrf.mxu1  ;;  %v449_v42 = vpop.f32.mrf.mxu0 }
 0x15a   :  { %v4494_v43 = vpop.f32.mrf.mxu1  ;;  %v5166_v44 = vpop.f32.mrf.mxu0 }
 0x15c   :  { %v453_v45 = vpop.f32.mrf.mxu0  ;;  %v5168_v46 = vpop.f32.mrf.mxu1 }
 0x15e   :  { %v454_v47 = vpop.f32.mrf.mxu0  ;;  %v5170_v48 = vpop.f32.mrf.mxu1 }
 0x160   :  { %v494_v49 = vpop.f32.mrf.mxu1  ;;  %v5172_v50 = vpop.f32.mrf.mxu0 }
 0x161   :  { %v1545_v49 = vlaneseq }
 0x162   :  { %v495_v51 = vpop.f32.mrf.mxu1  ;;  %v4499_v52 = vpop.f32.mrf.mxu0 }
 0x163   :  { %v537_v51 = vadd.f32 %v449_v42, %v5156_v26  ;;  %v540_v26 = vadd.f32 %v5170_v48, %v5162_v35 }
 0x164   :  { %v534_v53 = vpop.f32.mrf.mxu0  ;;  %v614_v54 = vpop.f32.mrf.mxu1 }
 0x166   :  { %v4500_v55 = vpop.f32.mrf.mxu0  ;;  %v616_v56 = vpop.f32.mrf.mxu1 }
 0x167   :  { %v538_v55 = vadd.f32 %v5166_v44, %v5158_v29  ;;  %v541_v29 = vadd.f32 %v5172_v50, %v5164_v38 }
 0x168   :  { %v618_v57 = vpop.f32.mrf.mxu1  ;;  %v655_v58 = vpop.f32.mrf.mxu0 }
 0x169   :  { %v702_v57 = vadd.f32 %v614_v54, %v537_v51 }
 0x16a   :  { %v619_v59 = vpop.f32.mrf.mxu1  ;;  %v5174_v60 = vpop.f32.mrf.mxu0 }
 0x16c   :  { %v659_v61 = vpop.f32.mrf.mxu0  ;;  %v5176_v62 = vpop.f32.mrf.mxu1 }
 0x16d   :  { %v706_v35 = vadd.f32 %v5176_v62, %v541_v29 }
 0x16e   :  { %v660_v63 = vpop.f32.mrf.mxu0  ;;  %v4505_v0 = vpop.f32.mrf.mxu1 }
 0x16f   :  { %v5183_v63 = vshrl.u32 %v1545_v49, 7  ;;  %v539_v0 = vadd.f32 %v5168_v46, %v5160_v32 }
 0x170   :  { %v699_v1 = vpop.f32.mrf.mxu1  ;;  %v779_v2 = vpop.f32.mrf.mxu0 }
 0x171   :  { %v703_v1 = vadd.f32 %v616_v56, %v538_v55  ;;  %v704_v42 = vadd.f32 %v655_v58, %v539_v0  ;;  %v1559_v49 = vsub.s32 3, %v5183_v63 }
 0x172   :  { %v4506_v3 = vpop.f32.mrf.mxu1  ;;  %v781_v4 = vpop.f32.mrf.mxu0 }
 0x173   :  { %v867_v3 = vadd.f32 %v779_v2, %v702_v57  ;;  %v1543_v2 = vld [vmem:[%s5814_s1] sm:$0x1f]  ;;  %s4765_s1 = smov 19  }
 0x174   :  { %v783_v5 = vpop.f32.mrf.mxu0  ;;  %v820_v6 = vpop.f32.mrf.mxu1  ;;  %v1560_v0 = vrot.slane %v1543_v2, %v1559_v49 }
 0x175   :  { %v869_v32 = vadd.f32 %v820_v6, %v704_v42 }
 0x176   :  { %v784_v7 = vpop.f32.mrf.mxu0  ;;  %v822_v8 = vpop.f32.mrf.mxu1 }
 0x178   :  { %v824_v9 = vpop.f32.mrf.mxu1  ;;  %v5178_v12 = vpop.f32.mrf.mxu0 }
 0x179   :  { %v868_v9 = vadd.f32 %v781_v4, %v703_v1  ;;  %v1551_v4 = vsub.s32 1, %v5183_v63 }
 0x17a   :  { %v825_v13 = vpop.f32.mrf.mxu1  ;;  %v4511_v14 = vpop.f32.mrf.mxu0 }
 0x17b   :  { %v1547_v14 = vsub.s32 0, %v5183_v63 }
 0x17c   :  { %v864_v15 = vpop.f32.mrf.mxu0  ;;  %v944_v16 = vpop.f32.mrf.mxu1 }
 0x17d   :  { %v1032_v13 = vadd.f32 %v944_v16, %v867_v3  ;;  %v705_v15 = vadd.f32 %v5174_v60, %v540_v26  ;;  %v871_v60 = vadd.f32 %v5178_v12, %v706_v35 }
 0x17e   :  { %v4512_v17 = vpop.f32.mrf.mxu0  ;;  %v946_v18 = vpop.f32.mrf.mxu1 }
 0x17f   :  { %v1033_v46 = vadd.f32 %v946_v18, %v868_v9  ;;  %v870_v38 = vadd.f32 %v822_v8, %v705_v15 }
 0x180   :  { %v948_v19 = vpop.f32.mrf.mxu1  ;;  %v985_v20 = vpop.f32.mrf.mxu0 }
 0x181   :  { %v1034_v50 = vadd.f32 %v985_v20, %v869_v32  ;;  %v1536_v19 = vpop.permute.xlu0 %1535 }
 0x182   :  { %v949_v21 = vpop.f32.mrf.mxu1  ;;  %v987_v22 = vpop.f32.mrf.mxu0 }
 0x183   :  { %v1548_v21 = vrot.slane %v1543_v2, %v1547_v14 }
 0x184   :  { %v989_v23 = vpop.f32.mrf.mxu0  ;;  %v1026_v24 = vpop.f32.mrf.mxu1 }
 0x185   :  { %v1555_v23 = vsub.s32 2, %v5183_v63 }
 0x186   :  { %v990_v25 = vpop.f32.mrf.mxu0  ;;  %v4517_v11 = vpop.f32.mrf.mxu1 }
 0x187   :  { %v1035_v25 = vadd.f32 %v987_v22, %v870_v38 }
 0x188   :  { %v1029_v27 = vpop.f32.mrf.mxu1  ;;  %v1109_v28 = vpop.f32.mrf.mxu0 }
 0x189   :  { %v1197_v56 = vadd.f32 %v1109_v28, %v1032_v13  ;;  %v1036_v28 = vadd.f32 %v1026_v24, %v871_v60 }
 0x18a   :  { %v4518_v30 = vpop.f32.mrf.mxu1  ;;  %v1111_v31 = vpop.f32.mrf.mxu0 }
 0x18b   :  { %v1198_v16 = vadd.f32 %v1111_v31, %v1033_v46 }
 0x18c   :  { %v1113_v33 = vpop.f32.mrf.mxu0  ;;  %v1150_v34 = vpop.f32.mrf.mxu1 }
 0x18d   :  { %v1199_v11 = vadd.f32 %v1150_v34, %v1034_v50 }
 0x18e   :  { %v1114_v36 = vpop.f32.mrf.mxu0  ;;  %v1152_v37 = vpop.f32.mrf.mxu1 }
 0x18f   :  { %v1552_v36 = vrot.slane %v1543_v2, %v1551_v4  ;;  %v1200_v8 = vadd.f32 %v1152_v37, %v1035_v25 }
 0x190   :  { %v1154_v39 = vpop.f32.mrf.mxu1  ;;  %v1191_v40 = vpop.f32.mrf.mxu0 }
 0x192   :  { %v1155_v41 = vpop.f32.mrf.mxu1  ;;  %v4523_v43 = vpop.f32.mrf.mxu0 }
 0x193   :  { %v1201_v41 = vadd.f32 %v1191_v40, %v1036_v28 }
 0x194   :  { %v1194_v45 = vpop.f32.mrf.mxu0  ;;  %v1274_v47 = vpop.f32.mrf.mxu1 }
 0x195   :  { %v1362_v17 = vadd.f32 %v1274_v47, %v1197_v56  ;;  %v1556_v45 = vrot.slane %v1543_v2, %v1555_v23  ;;  %v1563_v47 = vsub.s32 4, %v5183_v63 }
 0x196   :  { %v4524_v52 = vpop.f32.mrf.mxu0  ;;  %v1276_v53 = vpop.f32.mrf.mxu1 }
 0x197   :  { %v1363_v27 = vadd.f32 %v1276_v53, %v1198_v16 }
 0x198   :  { %v1278_v59 = vpop.f32.mrf.mxu1  ;;  %v1315_v61 = vpop.f32.mrf.mxu0 }
 0x199   :  { %v1364_v20 = vadd.f32 %v1315_v61, %v1199_v11  ;;  %v1564_v61 = vrot.slane %v1543_v2, %v1563_v47 }
 0x19a   :  { %v1279_v5 = vpop.f32.mrf.mxu1  ;;  %v1317_v7 = vpop.f32.mrf.mxu0 }
 0x19b   :  { %v1365_v22 = vadd.f32 %v1317_v7, %v1200_v8  ;;  %v5311_v8 = vld [vmem:[#allocation4] sm:$0xff] }
 0x19c   :  { %v1319_v44 = vpop.f32.mrf.mxu0  ;;  %v1356_v54 = vpop.f32.mrf.mxu1 }
 0x19d   :  { %v1366_v55 = vadd.f32 %v1356_v54, %v1201_v41 }
 0x19e   :  { %v1320_v48 = vpop.f32.mrf.mxu0  ;;  %v4529_v58 = vpop.f32.mrf.mxu1 }
 0x1a0   :  { %v1359_v6 = vpop.f32.mrf.mxu1  ;;  %v1439_v18 = vpop.f32.mrf.mxu0 }
 0x1a1   :  { %v1527_v62 = vadd.f32 %v1439_v18, %v1362_v17  ;;  %v3090_v6 = vld [vmem:[%s5819_s6] sm:$0xff] }
 0x1a2   :  { %v4530_v30 = vpop.f32.mrf.mxu1  ;;  %v1441_v33 = vpop.f32.mrf.mxu0 }
 0x1a3   :  { %v1528_v31 = vadd.f32 %v1441_v33, %v1363_v27  ;;  %v1538_v39 = vadd.f32 %v1536_v19, %v1527_v62  ;;  %v4217_v30 = vld [vmem:[%s5818_s5 + $0x4] sm:$0xf] }
 0x1a4   :  { %v1443_v43 = vpop.f32.mrf.mxu0  ;;  %v1480_v12 = vpop.f32.mrf.mxu1 }
 0x1a5   :  { %v1539_v34 = vadd.f32 %v1536_v19, %v1528_v31  ;;  %v1529_v51 = vadd.f32 %v1480_v12, %v1364_v20  ;;  %v1570_v52 = vmul.f32 %v1548_v21, %v1538_v39 }
 0x1a6   :  { %v1444_v24 = vpop.f32.mrf.mxu0  ;;  %v1482_v53 = vpop.f32.mrf.mxu1 }
 0x1a7   :  { %v1540_v57 = vadd.f32 %v1536_v19, %v1529_v51  ;;  %v1530_v37 = vadd.f32 %v1482_v53, %v1365_v22  ;;  %1586 = vrot.lane.b32.xlu1 %v1570_v52, %s4765_s1  ;;  %v1571_v26 = vmul.f32 %v1552_v36, %v1539_v34  ;;  %v1624_v51 = vld [vmem:[%s5818_s5] sm:$0xf] }
 0x1a8   :  { %v1484_v59 = vpop.f32.mrf.mxu1  ;;  %v1521_v40 = vpop.f32.mrf.mxu0 }
 0x1a9   :  { %v1541_v1 = vadd.f32 %v1536_v19, %v1530_v37  ;;  %v1531_v3 = vadd.f32 %v1521_v40, %v1366_v55  ;;  %v1572_v5 = vmul.f32 %v1556_v45, %v1540_v57 }
 0x1aa   :  { %v1485_v63 = vpop.f32.mrf.mxu1  ;;  %v4535_v7 = vpop.f32.mrf.mxu0 }
 0x1ab   :  { %v1542_v42 = vadd.f32 %v1536_v19, %v1531_v3  ;;  %1590 = vrot.lane.b32.xlu0 %v1572_v5, %s4765_s1  ;;  %1588 = vrot.lane.b32.xlu1 %v1571_v26, %s4765_s1  ;;  %v1573_v29 = vmul.f32 %v1560_v0, %v1541_v1  ;;  %v4228_v63 = vld [vmem:[%s5818_s5 + $0x8] sm:$0xf] }
 0x1ac   :  { %v1524_v9 = vpop.f32.mrf.mxu0 }
 0x1ad   :  { %v1574_v13 = vmul.f32 %v1564_v61, %v1542_v42 }
 0x1ae   :  { %v4536_v44 = vpop.f32.mrf.mxu0 }
 0x1af   :  { %1594 = vrot.lane.b32.xlu0 %v1574_v13, %s4765_s1  ;;  %1592 = vrot.lane.b32.xlu1 %v1573_v29, %s4765_s1 }
 0x219   :  { %v1587_v54 = vpop.permute.xlu1 %1586 }
 0x21a   :  { %1608 = vst.msk [vmem:[#allocation2] sm:$0xff] %vm1607_vm11, %v1587_v54 }
 0x21d   :  { %v1591_v14 = vpop.permute.xlu0 %1590  ;;  %v1589_v15 = vpop.permute.xlu1 %1588 }
 0x21e   :  { %v1597_v32 = vsel %vm1596_vm12, %v1587_v54, %v1589_v15  ;;  %v1598_v46 = vsel %vm1596_vm12, %v1589_v15, %v1591_v14 }
 0x21f   :  { %v5202_v56 = vpack.c.bf16 %v1597_v32, %v1597_v32  ;;  %v5214_v16 = vpack.c.bf16 %v1598_v46, %v1598_v46 }
 0x221   :  { %v1595_v2 = vpop.permute.xlu0 %1594  ;;  %v1593_v35 = vpop.permute.xlu1 %1592  ;;  %v1625_v48 = vld [vmem:[#allocation2] sm:$0xff]  ;;  %1647 = vrot.lane.b32.xlu0 %v5202_v56, %s4754_s16  ;;  %v1812_v34 = vsel %vm99_vm1, %v5214_v16, 0 }
 0x222   :  { %1613 = vst.msk [vmem:[#allocation2 + $0x28] sm:$0xff] %vm1596_vm12, %v1595_v2  ;;  %v1599_v58 = vsel %vm1596_vm12, %v1591_v14, %v1593_v35  ;;  %v1600_v4 = vsel %vm1596_vm12, %v1593_v35, %v1595_v2  ;;  %v5206_v38 = vpack.c.bf16 %v1625_v48, %v1625_v48  ;;  %v4234_v48 = vld [vmem:[%s5818_s5 + $0xc] sm:$0xf] }
 0x223   :  { %v5208_v50 = vpack.c.bf16 %v1599_v58, %v1599_v58  ;;  %v5218_v19 = vpack.c.bf16 %v1600_v4, %v1600_v4 }
 0x224   :  { %1645 = vrot.lane.b32.xlu1 %v5206_v38, %s4754_s16  ;;  %v1806_v45 = vsel %vm99_vm1, %v5206_v38, 0 }
 0x225   :  { %1651 = vrot.lane.b32.xlu0 %v5208_v50, %s4754_s16  ;;  %v1818_v55 = vsel %vm99_vm1, %v5218_v19, 0 }
 0x228   :  { %1649 = vrot.lane.b32.xlu1 %v5214_v16, %s4754_s16 }
 0x229   :  { %v1630_v17 = vld [vmem:[#allocation2 + $0x28] sm:$0xff] }
 0x22a   :  { %v1636_v60 = vpack.c.bf16 %v1630_v17, %v1630_v17 }
 0x22c   :  { %1653 = vrot.lane.b32.xlu1 %v5218_v19, %s4754_s16  ;;  %1655 = vrot.lane.b32.xlu0 %v1636_v60, %s4754_s16 }
 0x230   :  { %1944 = vrot.lane.b32.xlu1 %v5206_v38, %s4757_s0  ;;  %1946 = vrot.lane.b32.xlu0 %v5202_v56, %s4757_s0 }
 0x234   :  { %1948 = vrot.lane.b32.xlu1 %v5214_v16, %s4757_s0  ;;  %1950 = vrot.lane.b32.xlu0 %v5208_v50, %s4757_s0 }
 0x238   :  { %1952 = vrot.lane.b32.xlu1 %v5218_v19, %s4757_s0  ;;  %1954 = vrot.lane.b32.xlu0 %v1636_v60, %s4757_s0 }
 0x23c   :  { %2108 = vrot.lane.b32.xlu1 %v5206_v38, %s4758_s21  ;;  %2110 = vrot.lane.b32.xlu0 %v5202_v56, %s4758_s21 }
 0x240   :  { %2112 = vrot.lane.b32.xlu1 %v5214_v16, %s4758_s21  ;;  %2114 = vrot.lane.b32.xlu0 %v5208_v50, %s4758_s21 }
 0x244   :  { %2272 = vrot.lane.b32.xlu1 %v5206_v38, %s4759_s22  ;;  %2118 = vrot.lane.b32.xlu0 %v1636_v60, %s4758_s21 }
 0x248   :  { %2116 = vrot.lane.b32.xlu1 %v5218_v19, %s4758_s21  ;;  %2274 = vrot.lane.b32.xlu0 %v5202_v56, %s4759_s22 }
 0x24c   :  { %2276 = vrot.lane.b32.xlu1 %v5214_v16, %s4759_s22  ;;  %2278 = vrot.lane.b32.xlu0 %v5208_v50, %s4759_s22 }
 0x250   :  { %2280 = vrot.lane.b32.xlu1 %v5218_v19, %s4759_s22  ;;  %2282 = vrot.lane.b32.xlu0 %v1636_v60, %s4759_s22 }
 0x254   :  { %2436 = vrot.lane.b32.xlu1 %v5206_v38, %s4760_s23  ;;  %2438 = vrot.lane.b32.xlu0 %v5202_v56, %s4760_s23 }
 0x258   :  { %2440 = vrot.lane.b32.xlu1 %v5214_v16, %s4760_s23  ;;  %2442 = vrot.lane.b32.xlu0 %v5208_v50, %s4760_s23 }
 0x25c   :  { %2600 = vrot.lane.b32.xlu1 %v5206_v38, %s4761_s24  ;;  %2446 = vrot.lane.b32.xlu0 %v1636_v60, %s4760_s23 }
 0x260   :  { %2444 = vrot.lane.b32.xlu1 %v5218_v19, %s4760_s23  ;;  %2602 = vrot.lane.b32.xlu0 %v5202_v56, %s4761_s24 }
 0x264   :  { %2604 = vrot.lane.b32.xlu1 %v5214_v16, %s4761_s24  ;;  %2606 = vrot.lane.b32.xlu0 %v5208_v50, %s4761_s24 }
 0x268   :  { %2608 = vrot.lane.b32.xlu1 %v5218_v19, %s4761_s24  ;;  %2610 = vrot.lane.b32.xlu0 %v1636_v60, %s4761_s24 }
 0x26c   :  { %2764 = vrot.lane.b32.xlu1 %v5206_v38, %s4762_s25  ;;  %2766 = vrot.lane.b32.xlu0 %v5202_v56, %s4762_s25 }
 0x270   :  { %2768 = vrot.lane.b32.xlu1 %v5214_v16, %s4762_s25  ;;  %2770 = vrot.lane.b32.xlu0 %v5208_v50, %s4762_s25 }
 0x274   :  { %2928 = vrot.lane.b32.xlu1 %v5206_v38, %s4763_s26  ;;  %2774 = vrot.lane.b32.xlu0 %v1636_v60, %s4762_s25 }
 0x278   :  { %2772 = vrot.lane.b32.xlu1 %v5218_v19, %s4762_s25  ;;  %2930 = vrot.lane.b32.xlu0 %v5202_v56, %s4763_s26 }
 0x27c   :  { %2932 = vrot.lane.b32.xlu1 %v5214_v16, %s4763_s26  ;;  %2934 = vrot.lane.b32.xlu0 %v5208_v50, %s4763_s26 }
 0x280   :  { %2936 = vrot.lane.b32.xlu1 %v5218_v19, %s4763_s26  ;;  %2938 = vrot.lane.b32.xlu0 %v1636_v60, %s4763_s26 }
 0x284   :  { %3093 = vperm.xlu1 %4634, %v3090_v6  }
 0x293   :  { %v1648_v18 = vpop.permute.xlu0 %1647 }
 0x296   :  { %v1646_v21 = vpop.permute.xlu1 %1645 }
 0x297   :  { %v1657_v23 = vsel %vm89_vm0, %v1646_v21, %v1648_v18  ;;  %v1652_v11 = vpop.permute.xlu0 %1651 }
 0x298   :  { %v1666_v62 = vsel %vm99_vm1, %v1657_v23, 0 }
 0x29a   :  { %v1650_v25 = vpop.permute.xlu1 %1649 }
 0x29b   :  { %v1658_v27 = vsel %vm89_vm0, %v1648_v18, %v1650_v25  ;;  %v1659_v28 = vsel %vm89_vm0, %v1650_v25, %v1652_v11 }
 0x29c   :  { %4218 = vmatprep.subr.msk.bf16.mxu1 %vm99_vm1, %v1658_v27  ;;  %v1672_v39 = vsel %vm99_vm1, %v1659_v28, 0  ;;  %v4240_v27 = vld [vmem:[%s5818_s5 + $0x10] sm:$0xf] }
 0x29d   :  { %1695 = vmatpush1.bf16.msra.mxu1 %v1666_v62 }
 0x29e   :  { %v1654_v33 = vpop.permute.xlu1 %1653  ;;  %v1656_v36 = vpop.permute.xlu0 %1655  ;;  %4537 = vmatprep.subr.bf16.mxu1 %v5311_v8 }
 0x29f   :  { %v1660_v20 = vsel %vm89_vm0, %v1652_v11, %v1654_v33  ;;  %v1661_v31 = vsel %vm89_vm0, %v1654_v33, %v1656_v36 }
 0x2a0   :  { %4219 = vmatmul.mubr.msk.bf16.vlgmr.msra.gmra.mxu1 %vm95_vm2, %v4217_v30  ;;  %4220 = vmatprep.subr.msk.bf16.mxu0 %vm99_vm1, %v1660_v20  ;;  %v1678_v41 = vsel %vm99_vm1, %v1661_v31, 0 }
 0x2a1   :  { %1736 = vmatpush1.bf16.msra.mxu0 %v1672_v39  ;;  %4538 = vmatpush3.bf16.msra.mxu1 %v1678_v41 }
 0x2a2   :  { %4223 = vmatprep.subr.msk.bf16.mxu0 %vm99_vm1, %v5202_v56  ;;  %v1945_v43 = vpop.permute.xlu1 %1944  ;;  %v1947_v12 = vpop.permute.xlu0 %1946  ;;  %4225 = vmatprep.subr.msk.bf16.mxu1 %vm99_vm1, %v5208_v50 }
 0x2a3   :  { %4539 = vmatprep.mubr.msk.bf16.mxu1 %vm4764_vm3, %v5311_v8  ;;  %v1956_v57 = vsel %vm391_vm4, %v1945_v43, %v1947_v12 }
 0x2a4   :  { %4221 = vmatmul.mubr.msk.bf16.vlgmr.msra.gmra.mxu0 %vm95_vm2, %v4217_v30  ;;  %v1965_v40 = vsel %vm99_vm1, %v1956_v57, 0 }
 0x2a5   :  { %1835 = vmatpush1.bf16.msra.mxu0 %v1806_v45  ;;  %1852 = vmatprep.mubr.bf16.mxu0 %v4755_v10 }
 0x2a6   :  { %v1949_v47 = vpop.permute.xlu1 %1948  ;;  %v1951_v49 = vpop.permute.xlu0 %1950  ;;  %4543 = vmatprep.subr.bf16.mxu0 %v5311_v8 }
 0x2a7   :  { %v1957_v22 = vsel %vm391_vm4, %v1947_v12, %v1949_v47  ;;  %v1958_v61 = vsel %vm391_vm4, %v1949_v47, %v1951_v49 }
 0x2a8   :  { %4540 = vmatmul.mubr.msk.bf16.vlgmr.msra.gmra.mxu1 %vm95_vm2, %v4217_v30  ;;  %v1971_v5 = vsel %vm99_vm1, %v1958_v61, 0 }
 0x2a9   :  { %1876 = vmatpush1.bf16.msra.mxu1 %v1812_v34  ;;  %1893 = vmatprep.mubr.bf16.mxu1 %v4755_v10 }
 0x2aa   :  { %4229 = vmatprep.subr.msk.bf16.mxu1 %vm99_vm1, %v1957_v22  ;;  %v1953_v52 = vpop.permute.xlu1 %1952  ;;  %v1955_v24 = vpop.permute.xlu0 %1954  ;;  %v4246_v22 = vld [vmem:[%s5818_s5 + $0x14] sm:$0xf] }
 0x2ab   :  { %v1959_v53 = vsel %vm391_vm4, %v1951_v49, %v1953_v52  ;;  %v1960_v26 = vsel %vm391_vm4, %v1953_v52, %v1955_v24 }
 0x2ac   :  { %4224 = vmatmul.mubr.msk.bf16.vlgmr.msra.gmra.mxu0 %vm95_vm2, %v1624_v51  ;;  %v1977_v9 = vsel %vm99_vm1, %v1960_v26, 0 }
 0x2ad   :  { %4544 = vmatpush3.bf16.msra.mxu0 %v1818_v55  ;;  %4545 = vmatprep.mubr.msk.bf16.mxu0 %vm4764_vm3, %v5311_v8 }
 0x2ae   :  { %4231 = vmatprep.subr.msk.bf16.mxu0 %vm99_vm1, %v1959_v53  ;;  %v2109_v37 = vpop.permute.xlu1 %2108  ;;  %v2111_v59 = vpop.permute.xlu0 %2110 }
 0x2af   :  { %v2120_v13 = vsel %vm556_vm5, %v2109_v37, %v2111_v59 }
 0x2b0   :  { %4226 = vmatmul.mubr.msk.bf16.vlgmr.msra.gmra.mxu1 %vm95_vm2, %v1624_v51  ;;  %v2129_v14 = vsel %vm99_vm1, %v2120_v13, 0 }
 0x2b1   :  { %1994 = vmatpush1.bf16.msra.mxu1 %v1965_v40  ;;  %2011 = vmatprep.mubr.bf16.mxu1 %v4755_v10 }
 0x2b2   :  { %v2113_v0 = vpop.permute.xlu1 %2112  ;;  %v2115_v1 = vpop.permute.xlu0 %2114  ;;  %4549 = vmatprep.subr.bf16.mxu1 %v5311_v8 }
 0x2b3   :  { %v2121_v3 = vsel %vm556_vm5, %v2111_v59, %v2113_v0  ;;  %v2122_v15 = vsel %vm556_vm5, %v2113_v0, %v2115_v1 }
 0x2b4   :  { %4546 = vmatmul.mubr.msk.bf16.vlgmr.msra.gmra.mxu0 %vm95_vm2, %v1624_v51  ;;  %v2135_v2 = vsel %vm99_vm1, %v2122_v15, 0 }
 0x2b5   :  { %2035 = vmatpush1.bf16.msra.mxu0 %v1971_v5  ;;  %2052 = vmatprep.mubr.bf16.mxu0 %v4755_v10  ;;  %v4252_v5 = vld [vmem:[%s5818_s5 + $0x18] sm:$0xf] }
 0x2b6   :  { %4235 = vmatprep.subr.msk.bf16.mxu0 %vm99_vm1, %v2121_v3  ;;  %v2273_v7 = vpop.permute.xlu1 %2272  ;;  %v2119_v42 = vpop.permute.xlu0 %2118 }
 0x2b8   :  { %4230 = vmatmul.mubr.msk.bf16.vlgmr.msra.gmra.mxu1 %vm95_vm2, %v4228_v63 }
 0x2b9   :  { %4550 = vmatpush3.bf16.msra.mxu1 %v1977_v9  ;;  %4551 = vmatprep.mubr.msk.bf16.mxu1 %vm4764_vm3, %v5311_v8 }
 0x2ba   :  { %v2117_v29 = vpop.permute.xlu1 %2116  ;;  %v2275_v44 = vpop.permute.xlu0 %2274 }
 0x2bb   :  { %v2123_v54 = vsel %vm556_vm5, %v2115_v1, %v2117_v29  ;;  %v2124_v35 = vsel %vm556_vm5, %v2117_v29, %v2119_v42  ;;  %v2284_v16 = vsel %vm721_vm6, %v2273_v7, %v2275_v44 }
 0x2bc   :  { %4232 = vmatmul.mubr.msk.bf16.vlgmr.msra.gmra.mxu0 %vm95_vm2, %v4228_v63  ;;  %4237 = vmatprep.subr.msk.bf16.mxu1 %vm99_vm1, %v2123_v54  ;;  %v2141_v50 = vsel %vm99_vm1, %v2124_v35, 0  ;;  %v2293_v60 = vsel %vm99_vm1, %v2284_v16, 0 }
 0x2bd   :  { %2158 = vmatpush1.bf16.msra.mxu0 %v2129_v14  ;;  %2175 = vmatprep.mubr.bf16.mxu0 %v4755_v10 }
 0x2be   :  { %v2277_v32 = vpop.permute.xlu1 %2276  ;;  %v2279_v46 = vpop.permute.xlu0 %2278  ;;  %4555 = vmatprep.subr.bf16.mxu0 %v5311_v8 }
 0x2bf   :  { %v2285_v56 = vsel %vm721_vm6, %v2275_v44, %v2277_v32  ;;  %v2286_v6 = vsel %vm721_vm6, %v2277_v32, %v2279_v46 }
 0x2c0   :  { %4552 = vmatmul.mubr.msk.bf16.vlgmr.msra.gmra.mxu1 %vm95_vm2, %v4228_v63  ;;  %v2299_v25 = vsel %vm99_vm1, %v2286_v6, 0 }
 0x2c1   :  { %2199 = vmatpush1.bf16.msra.mxu1 %v2135_v2  ;;  %2216 = vmatprep.mubr.bf16.mxu1 %v4755_v10 }
 0x2c2   :  { %4241 = vmatprep.subr.msk.bf16.mxu1 %vm99_vm1, %v2285_v56  ;;  %v2281_v58 = vpop.permute.xlu1 %2280  ;;  %v2283_v4 = vpop.permute.xlu0 %2282  ;;  %v4258_v56 = vld [vmem:[%s5818_s5 + $0x1c] sm:$0xf] }
 0x2c3   :  { %v2287_v38 = vsel %vm721_vm6, %v2279_v46, %v2281_v58  ;;  %v2288_v11 = vsel %vm721_vm6, %v2281_v58, %v2283_v4 }
 0x2c4   :  { %4236 = vmatmul.mubr.msk.bf16.vlgmr.msra.gmra.mxu0 %vm95_vm2, %v4234_v48  ;;  %v2305_v30 = vsel %vm99_vm1, %v2288_v11, 0 }
 0x2c5   :  { %4556 = vmatpush3.bf16.msra.mxu0 %v2141_v50  ;;  %4557 = vmatprep.mubr.msk.bf16.mxu0 %vm4764_vm3, %v5311_v8 }
 0x2c6   :  { %4243 = vmatprep.subr.msk.bf16.mxu0 %vm99_vm1, %v2287_v38  ;;  %v2437_v17 = vpop.permute.xlu1 %2436  ;;  %v2439_v19 = vpop.permute.xlu0 %2438 }
 0x2c7   :  { %v2448_v33 = vsel %vm886_vm7, %v2437_v17, %v2439_v19 }
 0x2c8   :  { %4238 = vmatmul.mubr.msk.bf16.vlgmr.msra.gmra.mxu1 %vm95_vm2, %v4234_v48  ;;  %v2457_v39 = vsel %vm99_vm1, %v2448_v33, 0 }
 0x2c9   :  { %2322 = vmatpush1.bf16.msra.mxu1 %v2293_v60  ;;  %2339 = vmatprep.mubr.bf16.mxu1 %v4755_v10  ;;  %v4264_v60 = vld [vmem:[%s5818_s5 + $0x20] sm:$0xf] }
 0x2ca   :  { %v2441_v18 = vpop.permute.xlu1 %2440  ;;  %v2443_v21 = vpop.permute.xlu0 %2442  ;;  %4561 = vmatprep.subr.bf16.mxu1 %v5311_v8 }
 0x2cb   :  { %v2449_v23 = vsel %vm886_vm7, %v2439_v19, %v2441_v18  ;;  %v2450_v41 = vsel %vm886_vm7, %v2441_v18, %v2443_v21 }
 0x2cc   :  { %4558 = vmatmul.mubr.msk.bf16.vlgmr.msra.gmra.mxu0 %vm95_vm2, %v4234_v48  ;;  %v2463_v47 = vsel %vm99_vm1, %v2450_v41, 0 }
 0x2cd   :  { %2363 = vmatpush1.bf16.msra.mxu0 %v2299_v25  ;;  %2380 = vmatprep.mubr.bf16.mxu0 %v4755_v10 }
 0x2ce   :  { %4247 = vmatprep.subr.msk.bf16.mxu0 %vm99_vm1, %v2449_v23  ;;  %v2601_v62 = vpop.permute.xlu1 %2600  ;;  %v2447_v28 = vpop.permute.xlu0 %2446 }
 0x2d0   :  { %4242 = vmatmul.mubr.msk.bf16.vlgmr.msra.gmra.mxu1 %vm95_vm2, %v4240_v27 }
 0x2d1   :  { %4562 = vmatpush3.bf16.msra.mxu1 %v2305_v30  ;;  %4563 = vmatprep.mubr.msk.bf16.mxu1 %vm4764_vm3, %v5311_v8 }
 0x2d2   :  { %v2445_v36 = vpop.permute.xlu1 %2444  ;;  %v2603_v20 = vpop.permute.xlu0 %2602 }
 0x2d3   :  { %v2451_v31 = vsel %vm886_vm7, %v2443_v21, %v2445_v36  ;;  %v2452_v49 = vsel %vm886_vm7, %v2445_v36, %v2447_v28  ;;  %v2612_v53 = vsel %vm1051_vm8, %v2601_v62, %v2603_v20 }
 0x2d4   :  { %4244 = vmatmul.mubr.msk.bf16.vlgmr.msra.gmra.mxu0 %vm95_vm2, %v4240_v27  ;;  %4249 = vmatprep.subr.msk.bf16.mxu1 %vm99_vm1, %v2451_v31  ;;  %v2469_v24 = vsel %vm99_vm1, %v2452_v49, 0  ;;  %v2621_v37 = vsel %vm99_vm1, %v2612_v53, 0 }
 0x2d5   :  { %2486 = vmatpush1.bf16.msra.mxu0 %v2457_v39  ;;  %2503 = vmatprep.mubr.bf16.mxu0 %v4755_v10 }
 0x2d6   :  { %v2605_v43 = vpop.permute.xlu1 %2604  ;;  %v2607_v12 = vpop.permute.xlu0 %2606  ;;  %4567 = vmatprep.subr.bf16.mxu0 %v5311_v8 }
 0x2d7   :  { %v2613_v45 = vsel %vm1051_vm8, %v2603_v20, %v2605_v43  ;;  %v2614_v59 = vsel %vm1051_vm8, %v2605_v43, %v2607_v12 }
 0x2d8   :  { %4564 = vmatmul.mubr.msk.bf16.vlgmr.msra.gmra.mxu1 %vm95_vm2, %v4240_v27  ;;  %v2627_v1 = vsel %vm99_vm1, %v2614_v59, 0 }
 0x2d9   :  { %2527 = vmatpush1.bf16.msra.mxu1 %v2463_v47  ;;  %2544 = vmatprep.mubr.bf16.mxu1 %v4755_v10 }
 0x2da   :  { %4253 = vmatprep.subr.msk.bf16.mxu1 %vm99_vm1, %v2613_v45  ;;  %v2609_v34 = vpop.permute.xlu1 %2608  ;;  %v2611_v51 = vpop.permute.xlu0 %2610 }
 0x2db   :  { %v2615_v52 = vsel %vm1051_vm8, %v2607_v12, %v2609_v34  ;;  %v2616_v3 = vsel %vm1051_vm8, %v2609_v34, %v2611_v51 }
 0x2dc   :  { %4248 = vmatmul.mubr.msk.bf16.vlgmr.msra.gmra.mxu0 %vm95_vm2, %v4246_v22  ;;  %v2633_v7 = vsel %vm99_vm1, %v2616_v3, 0 }
 0x2dd   :  { %4568 = vmatpush3.bf16.msra.mxu0 %v2469_v24  ;;  %4569 = vmatprep.mubr.msk.bf16.mxu0 %vm4764_vm3, %v5311_v8 }
 0x2de   :  { %4255 = vmatprep.subr.msk.bf16.mxu0 %vm99_vm1, %v2615_v52  ;;  %v2765_v55 = vpop.permute.xlu1 %2764  ;;  %v2767_v57 = vpop.permute.xlu0 %2766 }
 0x2df   :  { %v2776_v42 = vsel %vm1216_vm9, %v2765_v55, %v2767_v57 }
 0x2e0   :  { %4250 = vmatmul.mubr.msk.bf16.vlgmr.msra.gmra.mxu1 %vm95_vm2, %v4246_v22  ;;  %v2785_v29 = vsel %vm99_vm1, %v2776_v42, 0 }
 0x2e1   :  { %2650 = vmatpush1.bf16.msra.mxu1 %v2621_v37  ;;  %2667 = vmatprep.mubr.bf16.mxu1 %v4755_v10 }
 0x2e2   :  { %v2769_v40 = vpop.permute.xlu1 %2768  ;;  %v2771_v61 = vpop.permute.xlu0 %2770  ;;  %4573 = vmatprep.subr.bf16.mxu1 %v5311_v8 }
 0x2e3   :  { %v2777_v0 = vsel %vm1216_vm9, %v2767_v57, %v2769_v40  ;;  %v2778_v54 = vsel %vm1216_vm9, %v2769_v40, %v2771_v61 }
 0x2e4   :  { %4570 = vmatmul.mubr.msk.bf16.vlgmr.msra.gmra.mxu0 %vm95_vm2, %v4246_v22  ;;  %v2791_v32 = vsel %vm99_vm1, %v2778_v54, 0 }
 0x2e5   :  { %2691 = vmatpush1.bf16.msra.mxu0 %v2627_v1  ;;  %2708 = vmatprep.mubr.bf16.mxu0 %v4755_v10 }
 0x2e6   :  { %4259 = vmatprep.subr.msk.bf16.mxu0 %vm99_vm1, %v2777_v0  ;;  %v2929_v26 = vpop.permute.xlu1 %2928  ;;  %v2775_v63 = vpop.permute.xlu0 %2774 }
 0x2e8   :  { %4254 = vmatmul.mubr.msk.bf16.vlgmr.msra.gmra.mxu1 %vm95_vm2, %v4252_v5 }
 0x2e9   :  { %4574 = vmatpush3.bf16.msra.mxu1 %v2633_v7  ;;  %4575 = vmatprep.mubr.msk.bf16.mxu1 %vm4764_vm3, %v5311_v8 }
 0x2ea   :  { %v2773_v9 = vpop.permute.xlu1 %2772  ;;  %v2931_v44 = vpop.permute.xlu0 %2930 }
 0x2eb   :  { %v2779_v13 = vsel %vm1216_vm9, %v2771_v61, %v2773_v9  ;;  %v2780_v46 = vsel %vm1216_vm9, %v2773_v9, %v2775_v63  ;;  %v2940_v4 = vsel %vm1381_vm10, %v2929_v26, %v2931_v44 }
 0x2ec   :  { %4256 = vmatmul.mubr.msk.bf16.vlgmr.msra.gmra.mxu0 %vm95_vm2, %v4252_v5  ;;  %4261 = vmatprep.subr.msk.bf16.mxu1 %vm99_vm1, %v2779_v13  ;;  %v2797_v58 = vsel %vm99_vm1, %v2780_v46, 0  ;;  %v2949_v38 = vsel %vm99_vm1, %v2940_v4, 0 }
 0x2ed   :  { %2814 = vmatpush1.bf16.msra.mxu0 %v2785_v29  ;;  %2831 = vmatprep.mubr.bf16.mxu0 %v4755_v10 }
 0x2ee   :  { %v2933_v14 = vpop.permute.xlu1 %2932  ;;  %4579 = vmatprep.subr.bf16.mxu0 %v5311_v8  ;;  %v2935_v2 = vpop.permute.xlu0 %2934 }
 0x2ef   :  { %v2941_v15 = vsel %vm1381_vm10, %v2931_v44, %v2933_v14  ;;  %v2942_v50 = vsel %vm1381_vm10, %v2933_v14, %v2935_v2 }
 0x2f0   :  { %4576 = vmatmul.mubr.msk.bf16.vlgmr.msra.gmra.mxu1 %vm95_vm2, %v4252_v5  ;;  %v2955_v17 = vsel %vm99_vm1, %v2942_v50, 0 }
 0x2f1   :  { %2855 = vmatpush1.bf16.msra.mxu1 %v2791_v32  ;;  %2872 = vmatprep.mubr.bf16.mxu1 %v4755_v10 }
 0x2f2   :  { %4265 = vmatprep.subr.msk.bf16.mxu1 %vm99_vm1, %v2941_v15  ;;  %v2937_v35 = vpop.permute.xlu1 %2936  ;;  %v2939_v16 = vpop.permute.xlu0 %2938 }
 0x2f3   :  { %v2943_v48 = vsel %vm1381_vm10, %v2935_v2, %v2937_v35  ;;  %v2944_v19 = vsel %vm1381_vm10, %v2937_v35, %v2939_v16 }
 0x2f4   :  { %4260 = vmatmul.mubr.msk.bf16.vlgmr.msra.gmra.mxu0 %vm95_vm2, %v4258_v56  ;;  %v2961_v6 = vsel %vm99_vm1, %v2944_v19, 0 }
 0x2f5   :  { %4580 = vmatpush3.bf16.msra.mxu0 %v2797_v58  ;;  %4581 = vmatprep.mubr.msk.bf16.mxu0 %vm4764_vm3, %v5311_v8 }
 0x2f6   :  { %4267 = vmatprep.subr.msk.bf16.mxu0 %vm99_vm1, %v2943_v48  ;;  %vm4092_vm1 = vcmask 130048  }
 0x2f8   :  { %4262 = vmatmul.mubr.msk.bf16.vlgmr.msra.gmra.mxu1 %vm95_vm2, %v4258_v56 }
 0x2f9   :  { %2978 = vmatpush1.bf16.msra.mxu1 %v2949_v38  ;;  %2995 = vmatprep.mubr.bf16.mxu1 %v4755_v10 }
 0x2fa   :  { %4585 = vmatprep.subr.bf16.mxu1 %v5311_v8 }
 0x2fc   :  { %4582 = vmatmul.mubr.msk.bf16.vlgmr.msra.gmra.mxu0 %vm95_vm2, %v4258_v56 }
 0x2fd   :  { %3019 = vmatpush1.bf16.msra.mxu0 %v2955_v17  ;;  %3036 = vmatprep.mubr.bf16.mxu0 %v4755_v10 }
 0x300   :  { %4266 = vmatmul.mubr.msk.bf16.vlgmr.msra.gmra.mxu1 %vm95_vm2, %v4264_v60 }
 0x301   :  { %4586 = vmatpush3.bf16.msra.mxu1 %v2961_v6  ;;  %4587 = vmatprep.mubr.msk.bf16.mxu1 %vm4764_vm3, %v5311_v8 }
 0x304   :  { %4268 = vmatmul.mubr.msk.bf16.vlgmr.msra.gmra.mxu0 %vm95_vm2, %v4264_v60 }
 0x308   :  { %4588 = vmatmul.mubr.msk.bf16.vlgmr.msra.gmra.mxu1 %vm95_vm2, %v4264_v60  ;;  %vm4136_vm2 = vcmask 211968  }
 0x360   :  { %v1714_v18 = vpop.f32.mrf.mxu1 }
 0x362   :  { %v1716_v21 = vpop.f32.mrf.mxu1 }
 0x364   :  { %v1718_v23 = vpop.f32.mrf.mxu1  ;;  %v1755_v25 = vpop.f32.mrf.mxu0 }
 0x366   :  { %v1719_v11 = vpop.f32.mrf.mxu1  ;;  %v1757_v27 = vpop.f32.mrf.mxu0 }
 0x368   :  { %v1759_v62 = vpop.f32.mrf.mxu0  ;;  %v1796_v10 = vpop.f32.mrf.mxu1 }
 0x36a   :  { %v1760_v28 = vpop.f32.mrf.mxu0  ;;  %v4541_v30 = vpop.f32.mrf.mxu1 }
 0x36c   :  { %v1799_v33 = vpop.f32.mrf.mxu1  ;;  %v1854_v36 = vpop.f32.mrf.mxu0 }
 0x36d   :  { %v1855_v20 = vadd.f32 %v1854_v36, %v1714_v18 }
 0x36e   :  { %v4542_v31 = vpop.f32.mrf.mxu1  ;;  %v1856_v39 = vpop.f32.mrf.mxu0 }
 0x36f   :  { %v5492_v41 = vadd.f32 %v1856_v39, %v1716_v21 }
 0x370   :  { %v1858_v43 = vpop.f32.mrf.mxu0  ;;  %v1895_v12 = vpop.f32.mrf.mxu1 }
 0x371   :  { %v5494_v45 = vadd.f32 %v1895_v12, %v1755_v25 }
 0x372   :  { %v1859_v47 = vpop.f32.mrf.mxu0  ;;  %v1897_v49 = vpop.f32.mrf.mxu1 }
 0x373   :  { %v5496_v22 = vadd.f32 %v1897_v49, %v1757_v27 }
 0x374   :  { %v1899_v34 = vpop.f32.mrf.mxu1  ;;  %v1936_v51 = vpop.f32.mrf.mxu0 }
 0x375   :  { %v5498_v52 = vadd.f32 %v1936_v51, %v1796_v10 }
 0x376   :  { %v1900_v24 = vpop.f32.mrf.mxu1  ;;  %v4547_v53 = vpop.f32.mrf.mxu0 }
 0x378   :  { %v1939_v55 = vpop.f32.mrf.mxu0  ;;  %v2013_v57 = vpop.f32.mrf.mxu1 }
 0x379   :  { %v5500_v37 = vadd.f32 %v2013_v57, %v1855_v20 }
 0x37a   :  { %v4548_v59 = vpop.f32.mrf.mxu0  ;;  %v2015_v40 = vpop.f32.mrf.mxu1 }
 0x37c   :  { %v2017_v61 = vpop.f32.mrf.mxu1  ;;  %v2054_v0 = vpop.f32.mrf.mxu0 }
 0x37e   :  { %v2018_v1 = vpop.f32.mrf.mxu1  ;;  %v5502_v3 = vpop.f32.mrf.mxu0 }
 0x380   :  { %v2058_v5 = vpop.f32.mrf.mxu0  ;;  %v5504_v26 = vpop.f32.mrf.mxu1 }
 0x382   :  { %v2059_v63 = vpop.f32.mrf.mxu0  ;;  %v4553_v7 = vpop.f32.mrf.mxu1 }
 0x383   :  { %v2102_v63 = vadd.f32 %v2015_v40, %v5492_v41 }
 0x384   :  { %v2098_v42 = vpop.f32.mrf.mxu1  ;;  %v2177_v9 = vpop.f32.mrf.mxu0 }
 0x386   :  { %v4554_v13 = vpop.f32.mrf.mxu1  ;;  %v2179_v29 = vpop.f32.mrf.mxu0 }
 0x387   :  { %v2103_v13 = vadd.f32 %v2054_v0, %v5494_v45 }
 0x388   :  { %v2181_v44 = vpop.f32.mrf.mxu0  ;;  %v2218_v54 = vpop.f32.mrf.mxu1 }
 0x389   :  { %v2266_v44 = vadd.f32 %v2179_v29, %v2102_v63  ;;  %v4657_v63 = vld [vmem:[%s5815_s2 + $0x70] sm:$0xff]  }
 0x38a   :  { %v2182_v14 = vpop.f32.mrf.mxu0  ;;  %v2220_v15 = vpop.f32.mrf.mxu1 }
 0x38c   :  { %v2222_v32 = vpop.f32.mrf.mxu1  ;;  %v2259_v46 = vpop.f32.mrf.mxu0 }
 0x38e   :  { %v2223_v56 = vpop.f32.mrf.mxu1  ;;  %v4559_v2 = vpop.f32.mrf.mxu0 }
 0x38f   :  { %v2104_v56 = vadd.f32 %v5502_v3, %v5496_v22  ;;  %v2265_v2 = vadd.f32 %v2177_v9, %v5500_v37 }
 0x390   :  { %v2262_v35 = vpop.f32.mrf.mxu0  ;;  %v2341_v48 = vpop.f32.mrf.mxu1 }
 0x391   :  { %v2267_v35 = vadd.f32 %v2218_v54, %v2103_v13  ;;  %v2268_v41 = vadd.f32 %v2220_v15, %v2104_v56  ;;  %v2429_v40 = vadd.f32 %v2341_v48, %v2265_v2  ;;  %v4660_v13 = vld [vmem:[%s5815_s2 + $0xb8] sm:$0xff]   ;;  %v4658_v56 = vld [vmem:[%s5815_s2 + $0x30] sm:$0xff]   ;;  %v4661_v2 = vld [vmem:[%s5815_s2 + $0x68] sm:$0xff]  }
 0x392   :  { %v4560_v58 = vpop.f32.mrf.mxu0  ;;  %v2343_v4 = vpop.f32.mrf.mxu1 }
 0x393   :  { %v2430_v58 = vadd.f32 %v2343_v4, %v2266_v44 }
 0x394   :  { %v2345_v38 = vpop.f32.mrf.mxu1  ;;  %v2382_v50 = vpop.f32.mrf.mxu0 }
 0x395   :  { %v2105_v38 = vadd.f32 %v5504_v26, %v5498_v52 }
 0x396   :  { %v2346_v16 = vpop.f32.mrf.mxu1  ;;  %v2384_v17 = vpop.f32.mrf.mxu0 }
 0x397   :  { %v2269_v45 = vadd.f32 %v2259_v46, %v2105_v38  ;;  %v4662_v38 = vld [vmem:[%s5815_s2 + $0x28] sm:$0xff]  }
 0x398   :  { %v2386_v19 = vpop.f32.mrf.mxu0  ;;  %v2423_v60 = vpop.f32.mrf.mxu1 }
 0x399   :  { %v2433_v3 = vadd.f32 %v2423_v60, %v2269_v45  ;;  %v4675_v45 = vld [vmem:[%s5815_s2 + $0xd8] sm:$0xff]  }
 0x39a   :  { %v2387_v6 = vpop.f32.mrf.mxu0  ;;  %v4565_v18 = vpop.f32.mrf.mxu1 }
 0x39b   :  { %v2431_v6 = vadd.f32 %v2382_v50, %v2267_v35  ;;  %v4664_v35 = vld [vmem:[%s5815_s2 + $0xb0] sm:$0xff]  }
 0x39c   :  { %v2426_v21 = vpop.f32.mrf.mxu1  ;;  %v2505_v23 = vpop.f32.mrf.mxu0 }
 0x39d   :  { %v2432_v21 = vadd.f32 %v2384_v17, %v2268_v41  ;;  %v4671_v41 = vld [vmem:[%s5815_s2 + $0xe0] sm:$0xff]  }
 0x39e   :  { %v4566_v25 = vpop.f32.mrf.mxu1  ;;  %v2507_v11 = vpop.f32.mrf.mxu0 }
 0x39f   :  { %v2594_v18 = vadd.f32 %v2507_v11, %v2430_v58  ;;  %v2593_v25 = vadd.f32 %v2505_v23, %v2429_v40  ;;  %v4667_v58 = vld [vmem:[%s5815_s2 + $0xe8] sm:$0xff]   ;;  %v4666_v40 = vld [vmem:[%s5815_s2 + $0x20] sm:$0xff]  }
 0x3a0   :  { %v2509_v27 = vpop.f32.mrf.mxu0  ;;  %v2546_v62 = vpop.f32.mrf.mxu1 }
 0x3a1   :  { %v2595_v27 = vadd.f32 %v2546_v62, %v2431_v6  ;;  %v4669_v6 = vld [vmem:[%s5815_s2 + $0x58] sm:$0xff]  }
 0x3a2   :  { %v2510_v10 = vpop.f32.mrf.mxu0  ;;  %v2548_v28 = vpop.f32.mrf.mxu1 }
 0x3a3   :  { %v2596_v54 = vadd.f32 %v2548_v28, %v2432_v21  ;;  %v4676_v21 = vld [vmem:[%s5815_s2 + $0x98] sm:$0xff]  }
 0x3a4   :  { %v2550_v30 = vpop.f32.mrf.mxu1  ;;  %v2587_v33 = vpop.f32.mrf.mxu0 }
 0x3a5   :  { %v2597_v26 = vadd.f32 %v2587_v33, %v2433_v3  ;;  %v4679_v3 = vld [vmem:[%s5815_s2 + $0xd0] sm:$0xff]  }
 0x3a6   :  { %v2551_v36 = vpop.f32.mrf.mxu1  ;;  %v4571_v20 = vpop.f32.mrf.mxu0 }
 0x3a8   :  { %v2590_v31 = vpop.f32.mrf.mxu0  ;;  %v2669_v39 = vpop.f32.mrf.mxu1 }
 0x3a9   :  { %v2757_v4 = vadd.f32 %v2669_v39, %v2593_v25  ;;  %v3094_v31 = vpop.permute.xlu1 %3093  ;;  %v4674_v25 = vld [vmem:[%s5815_s2 + $0x10] sm:$0xff]  }
 0x3aa   :  { %v4572_v43 = vpop.f32.mrf.mxu0  ;;  %v2671_v12 = vpop.f32.mrf.mxu1 }
 0x3ab   :  { %v2758_v22 = vadd.f32 %v2671_v12, %v2594_v18  ;;  %v4672_v18 = vld [vmem:[%s5815_s2 + $0xa0] sm:$0xff]  }
 0x3ac   :  { %v2673_v47 = vpop.f32.mrf.mxu1  ;;  %v2710_v49 = vpop.f32.mrf.mxu0 }
 0x3ad   :  { %v2759_v10 = vadd.f32 %v2710_v49, %v2595_v27  ;;  %v4677_v27 = vld [vmem:[%s5815_s2 + $0x48] sm:$0xff]  }
 0x3ae   :  { %v2674_v34 = vpop.f32.mrf.mxu1  ;;  %v2712_v51 = vpop.f32.mrf.mxu0 }
 0x3af   :  { %v2760_v48 = vadd.f32 %v2712_v51, %v2596_v54 }
 0x3b0   :  { %v2714_v24 = vpop.f32.mrf.mxu0  ;;  %v2751_v53 = vpop.f32.mrf.mxu1 }
 0x3b1   :  { %v2761_v17 = vadd.f32 %v2751_v53, %v2597_v26 }
 0x3b2   :  { %v2715_v55 = vpop.f32.mrf.mxu0  ;;  %v4577_v57 = vpop.f32.mrf.mxu1 }
 0x3b4   :  { %v2754_v59 = vpop.f32.mrf.mxu1  ;;  %v2833_v61 = vpop.f32.mrf.mxu0 }
 0x3b5   :  { %v2921_v50 = vadd.f32 %v2833_v61, %v2757_v4  ;;  %v4682_v4 = vld [vmem:[%s5815_s2] sm:$0xff]  }
 0x3b6   :  { %v4578_v1 = vpop.f32.mrf.mxu1  ;;  %v2835_v5 = vpop.f32.mrf.mxu0 }
 0x3b7   :  { %v2922_v52 = vadd.f32 %v2835_v5, %v2758_v22  ;;  %v4655_v1 = vld [vmem:[%s5815_s2 + $0x78] sm:$0xff]   ;;  %v4678_v22 = vld [vmem:[%s5815_s2 + $0x8] sm:$0xff]  }
 0x3b8   :  { %v2837_v7 = vpop.f32.mrf.mxu0  ;;  %v2874_v42 = vpop.f32.mrf.mxu1  ;;  %v4656_v5 = vld [vmem:[%s5815_s2 + $0x38] sm:$0xff]   ;;  %4384 = vmatprep.subr.bf16.mxu0 %v4655_v1 }
 0x3b9   :  { %v2923_v11 = vadd.f32 %v2874_v42, %v2759_v10  ;;  %v4659_v42 = vld [vmem:[%s5815_s2 + $0xf8] sm:$0xff]   ;;  %4385 = vmatpush3.bf16.msra.mxu0 %v4656_v5  ;;  %v4683_v10 = vld [vmem:[%s5815_s2 + $0xc8] sm:$0xff]  }
 0x3ba   :  { %v2838_v14 = vpop.f32.mrf.mxu0  ;;  %v2876_v32 = vpop.f32.mrf.mxu1  ;;  %4406 = vmatprep.subr.bf16.mxu1 %v4659_v42  ;;  %4386 = vmatprep.subr.bf16.mxu0 %v4657_v63 }
 0x3bb   :  { %v2924_v23 = vadd.f32 %v2876_v32, %v2760_v48  ;;  %v4663_v14 = vld [vmem:[%s5815_s2 + $0xf0] sm:$0xff]   ;;  %4407 = vmatpush3.bf16.msra.mxu1 %v4660_v13 }
 0x3bc   :  { %v2878_v16 = vpop.f32.mrf.mxu1  ;;  %v2915_v19 = vpop.f32.mrf.mxu0  ;;  %4408 = vmatprep.subr.bf16.mxu1 %v4663_v14 }
 0x3bd   :  { %v2925_v28 = vadd.f32 %v2915_v19, %v2761_v17  ;;  %4387 = vmatpush3.bf16.msra.mxu0 %v4658_v56  ;;  %v4665_v16 = vld [vmem:[%s5815_s2 + $0x60] sm:$0xff]   ;;  %v4668_v19 = vld [vmem:[%s5815_s2 + $0xa8] sm:$0xff]  }
 0x3be   :  { %v2879_v0 = vpop.f32.mrf.mxu1  ;;  %v4583_v29 = vpop.f32.mrf.mxu0  ;;  %4388 = vmatprep.subr.bf16.mxu0 %v4661_v2  ;;  %v4688_v2 = vld [vmem:[%s5815_s2 + $0x118] sm:$0xff]  }
 0x3bf   :  { %4409 = vmatpush3.bf16.msra.mxu1 %v4664_v35  ;;  %v4670_v0 = vld [vmem:[%s5815_s2 + $0x18] sm:$0xff]   ;;  %v4673_v29 = vld [vmem:[%s5815_s2 + $0x50] sm:$0xff]  }
 0x3c0   :  { %v2918_v37 = vpop.f32.mrf.mxu0  ;;  %v2997_v9 = vpop.f32.mrf.mxu1  ;;  %4410 = vmatprep.subr.bf16.mxu1 %v4667_v58  ;;  %v4689_v35 = vld [vmem:[%s5815_s2 + $0x110] sm:$0xff]   ;;  %v4690_v58 = vld [vmem:[%s5815_s2 + $0x108] sm:$0xff]  }
 0x3c1   :  { %v3085_v62 = vadd.f32 %v2997_v9, %v2921_v50  ;;  %4389 = vmatpush3.bf16.msra.mxu0 %v4662_v38  ;;  %v4680_v37 = vld [vmem:[%s5815_s2 + $0x90] sm:$0xff]   ;;  %v4681_v9 = vld [vmem:[%s5815_s2 + $0x40] sm:$0xff]  }
 0x3c2   :  { %v4584_v30 = vpop.f32.mrf.mxu0  ;;  %v2999_v15 = vpop.f32.mrf.mxu1  ;;  %4390 = vmatprep.subr.bf16.mxu0 %v4665_v16  ;;  %v4691_v38 = vld [vmem:[%s5815_s2 + $0x100] sm:$0xff]  }
 0x3c3   :  { %v3086_v46 = vadd.f32 %v2999_v15, %v2922_v52  ;;  %v5519_v24 = vadd.f32 %v3094_v31, %v3085_v62  ;;  %4411 = vmatpush3.bf16.msra.mxu1 %v4668_v19  ;;  %v4684_v30 = vld [vmem:[%s5815_s2 + $0x88] sm:$0xff]   ;;  %v4687_v62 = vld [vmem:[%s5815_s2 + $0x80] sm:$0xff]  }
 0x3c4   :  { %v3001_v36 = vpop.f32.mrf.mxu1  ;;  %v3038_v20 = vpop.f32.mrf.mxu0  ;;  %4412 = vmatprep.subr.bf16.mxu1 %v4671_v41  ;;  %v4692_v41 = vld [vmem:[%s5820_s7 + $0x78] sm:$0xff]  }
 0x3c5   :  { %v3087_v60 = vadd.f32 %v3038_v20, %v2923_v11  ;;  %v5513_v39 = vadd.f32 %v3094_v31, %v3086_v46  ;;  %4391 = vmatpush3.bf16.msra.mxu0 %v4666_v40  ;;  %v4685_v36 = vld [vmem:[%s5815_s2 + $0xc0] sm:$0xff]   ;;  %v4693_v40 = vld [vmem:[%s5820_s7 + $0x38] sm:$0xff]  }
 0x3c6   :  { %v3002_v43 = vpop.f32.mrf.mxu1  ;;  %v3040_v12 = vpop.f32.mrf.mxu0  ;;  %4392 = vmatprep.subr.bf16.mxu0 %v4669_v6  ;;  %v4694_v6 = vld [vmem:[%s5820_s7 + $0x70] sm:$0xff]  }
 0x3c7   :  { %v5515_v47 = vadd.f32 %v3094_v31, %v3087_v60  ;;  %v3088_v33 = vadd.f32 %v3040_v12, %v2924_v23  ;;  %4413 = vmatpush3.bf16.msra.mxu1 %v4672_v18  ;;  %v4697_v18 = vld [vmem:[%s5820_s7 + $0xf8] sm:$0xff]  }
 0x3c8   :  { %v3042_v49 = vpop.f32.mrf.mxu0  ;;  %v3079_v34 = vpop.f32.mrf.mxu1  ;;  %4414 = vmatprep.subr.bf16.mxu1 %v4675_v45  ;;  %v4699_v45 = vld [vmem:[%s5820_s7 + $0xb8] sm:$0xff]  }
 0x3c9   :  { %v4635_v51 = vpack.i.bf16 %v5515_v47, %v5513_v39  ;;  %v5521_v53 = vadd.f32 %v3094_v31, %v3088_v33  ;;  %v3089_v55 = vadd.f32 %v3079_v34, %v2925_v28  ;;  %4393 = vmatpush3.bf16.msra.mxu0 %v4670_v0  ;;  %v4695_v0 = vld [vmem:[%s5820_s7 + $0x30] sm:$0xff]  }
 0x3ca   :  { %v3043_v57 = vpop.f32.mrf.mxu0  ;;  %v4589_v59 = vpop.f32.mrf.mxu1  ;;  %4394 = vmatprep.subr.bf16.mxu0 %v4673_v29  ;;  %v4701_v29 = vld [vmem:[%s5820_s7 + $0xf0] sm:$0xff]  }
 0x3cb   :  { %v4640_v61 = vpack.i.bf16 %v5519_v24, %v5521_v53  ;;  %4636 = vrot.lane.b32.xlu0 %v4635_v51, %s4754_s16  ;;  %v5541_v44 = vadd.f32 %v3094_v31, %v3089_v55  ;;  %4415 = vmatpush3.bf16.msra.mxu1 %v4676_v21  ;;  %v4696_v21 = vld [vmem:[%s5820_s7 + $0x68] sm:$0xff]  }
 0x3cc   :  { %v3082_v7 = vpop.f32.mrf.mxu1  ;;  %4416 = vmatprep.subr.bf16.mxu1 %v4679_v3  ;;  %v4702_v3 = vld [vmem:[%s5820_s7 + $0x20] sm:$0xff]  }
 0x3cd   :  { %4641 = vrot.lane.b32.xlu1 %v4640_v61, %s4754_s16  ;;  %4395 = vmatpush3.bf16.msra.mxu0 %v4674_v25  ;;  %v4686_v7 = vld [vmem:[%s5815_s2 + $0x120] sm:$0xff]   ;;  %v4703_v25 = vld [vmem:[%s5820_s7 + $0xb0] sm:$0xff]  }
 0x3ce   :  { %v4590_v32 = vpop.f32.mrf.mxu1  ;;  %4396 = vmatprep.subr.bf16.mxu0 %v4677_v27  ;;  %v4698_v27 = vld [vmem:[%s5820_s7 + $0x28] sm:$0xff]  }
 0x3cf   :  { %3124 = vrot.lane.b32.xlu0 %v5541_v44, %s4754_s16  ;;  %4417 = vmatpush3.bf16.msra.mxu1 %v4680_v37 }
 0x3d0   :  { %4418 = vmatprep.subr.bf16.mxu1 %v4683_v10 }
 0x3d1   :  { %4397 = vmatpush3.bf16.msra.mxu0 %v4678_v22  ;;  %v4700_v22 = vld [vmem:[%s5820_s7 + $0x60] sm:$0xff]  }
 0x3d2   :  { %4398 = vmatprep.subr.bf16.mxu0 %v4681_v9 }
 0x3d3   :  { %4419 = vmatpush3.bf16.msra.mxu1 %v4684_v30  ;;  %v4704_v30 = vld [vmem:[%s5820_s7 + $0x58] sm:$0xff]  }
 0x3d4   :  { %4420 = vmatprep.subr.bf16.mxu1 %v4685_v36  ;;  %v4709_v36 = vld [vmem:[%s5820_s7 + $0xe0] sm:$0xff]  }
 0x3d5   :  { %4399 = vmatpush3.bf16.msra.mxu0 %v4682_v4 }
 0x3d6   :  { %4591 = vmatprep.subr.bf16.mxu0 %v5311_v8 }
 0x3d7   :  { %4421 = vmatpush3.bf16.msra.mxu1 %v4687_v62 }
 0x3d8   :  { %4434 = vmatprep.subr.bf16.mxu1 %v4692_v41 }
 0x43d   :  { %v4637_v54 = vpop.permute.xlu0 %4636 }
 0x43e   :  { %v4639_v52 = vunpack.i.h.bf16 %v4637_v54  ;;  %v4638_v26 = vunpack.i.l.bf16 %v4637_v54 }
 0x43f   :  { %v4642_v15 = vpop.permute.xlu1 %4641 }
 0x440   :  { %v3128_v48 = vsel %vm89_vm0, %v4638_v26, %v4639_v52  ;;  %v4644_v50 = vunpack.i.h.bf16 %v4642_v15  ;;  %v4643_v11 = vunpack.i.l.bf16 %v4642_v15  ;;  %v4705_v15 = vld [vmem:[%s5820_s7 + $0xe8] sm:$0xff]  }
 0x441   :  { %v3125_v46 = vpop.permute.xlu0 %3124  ;;  %v3137_v31 = vmax.f32 %v5513_v39, %v3128_v48 }
 0x442   :  { %v3127_v20 = vsel %vm89_vm0, %v4644_v50, %v4638_v26  ;;  %v3129_v17 = vsel %vm89_vm0, %v4639_v52, %v4643_v11  ;;  %v3130_v23 = vsel %vm89_vm0, %v4643_v11, %v3125_v46  ;;  %v3140_v28 = vmax.f32 %v5541_v44, %v3125_v46  ;;  %v4706_v50 = vld [vmem:[%s5820_s7 + $0x18] sm:$0xff]   ;;  %v4707_v11 = vld [vmem:[%s5820_s7 + $0xa8] sm:$0xff]   ;;  %v4708_v46 = vld [vmem:[%s5820_s7 + $0x50] sm:$0xff]  }
 0x443   :  { %v3136_v60 = vmax.f32 %v5519_v24, %v3127_v20  ;;  %v3138_v43 = vmax.f32 %v5515_v47, %v3129_v17  ;;  %v3139_v12 = vmax.f32 %v5521_v53, %v3130_v23  ;;  %v4710_v20 = vld [vmem:[%s5820_s7 + $0x10] sm:$0xff]   ;;  %v4711_v17 = vld [vmem:[%s5820_s7 + $0xa0] sm:$0xff]   ;;  %vm4032_vm0 = vcmask 261120  }
 0x445   :  { %3146 = vrot.lane.b32.xlu0 %v3136_v60, %s4758_s21  ;;  %v4645_v33 = vpack.i.bf16 %v3138_v43, %v3137_v31  ;;  %v4650_v49 = vpack.i.bf16 %v3140_v28, %v3139_v12 }
 0x447   :  { %4646 = vrot.lane.b32.xlu1 %v4645_v33, %s4758_s21 }
 0x44b   :  { %4651 = vrot.lane.b32.xlu1 %v4650_v49, %s4758_s21 }
 0x4b7   :  { %v3147_v24 = vpop.permute.xlu0 %3146 }
 0x4b9   :  { %v4647_v34 = vpop.permute.xlu1 %4646 }
 0x4ba   :  { %v4649_v39 = vunpack.i.h.bf16 %v4647_v34  ;;  %v4648_v51 = vunpack.i.l.bf16 %v4647_v34  ;;  %v4716_v34 = vld [vmem:[%s5820_s7 + $0x40] sm:$0xff]  }
 0x4bc   :  { %v3157_v47 = vsel %vm556_vm5, %v3147_v24, %v4648_v51  ;;  %v3158_v55 = vsel %vm556_vm5, %v4648_v51, %v4649_v39  ;;  %v4718_v24 = vld [vmem:[%s5820_s7] sm:$0xff]  }
 0x4bd   :  { %v3166_v57 = vmax.f32 %v3136_v60, %v3157_v47  ;;  %v4652_v53 = vpop.permute.xlu1 %4651  ;;  %v3167_v59 = vmax.f32 %v3137_v31, %v3158_v55  ;;  %v4712_v31 = vld [vmem:[%s5820_s7 + $0x48] sm:$0xff]   ;;  %v4713_v60 = vld [vmem:[%s5820_s7 + $0xd8] sm:$0xff]   ;;  %v4719_v47 = vld [vmem:[%s5820_s7 + $0x90] sm:$0xff]  }
 0x4be   :  { %v4654_v61 = vunpack.i.h.bf16 %v4652_v53  ;;  %v4653_v1 = vunpack.i.l.bf16 %v4652_v53 }
 0x4bf   :  { %v3172_v5 = vpack.c.bf16 %v3167_v59, %v3167_v59  ;;  %v3171_v63 = vpack.c.bf16 %v3166_v57, %v3166_v57 }
 0x4c0   :  { %v3159_v42 = vsel %vm556_vm5, %v4649_v39, %v4653_v1  ;;  %v3160_v13 = vsel %vm556_vm5, %v4653_v1, %v4654_v61  ;;  %v3170_v16 = vmax.f32 %v3140_v28, %v4654_v61  ;;  %v4717_v39 = vld [vmem:[%s5820_s7 + $0xd0] sm:$0xff]   ;;  %v4720_v1 = vld [vmem:[%s5820_s7 + $0xc8] sm:$0xff]  }
 0x4c1   :  { %v3168_v44 = vmax.f32 %v3138_v43, %v3159_v42  ;;  %3508 = vmatprep.mubr.bf16.mxu0 %v3172_v5  ;;  %v3169_v14 = vmax.f32 %v3139_v12, %v3160_v13  ;;  %v4714_v43 = vld [vmem:[%s5820_s7 + $0x8] sm:$0xff]   ;;  %v4715_v12 = vld [vmem:[%s5820_s7 + $0x98] sm:$0xff]   ;;  %v4723_v13 = vld [vmem:[%s5820_s7 + $0x80] sm:$0xff]  }
 0x4c2   :  { %3509 = vmatmul.mubr.bf16.vlgmr.msra.gmra.mxu0 %v3171_v63  ;;  %v3175_v19 = vpack.c.bf16 %v3170_v16, %v3170_v16  ;;  %v4721_v63 = vld [vmem:[%s5820_s7 + $0x88] sm:$0xff]  }
 0x4c3   :  { %4592 = vmatpush3.bf16.msra.mxu0 %v4686_v7  ;;  %v3174_v32 = vpack.c.bf16 %v3169_v14, %v3169_v14  ;;  %v3173_v56 = vpack.c.bf16 %v3168_v44, %v3168_v44  ;;  %4601 = vmatprep.mubr.msk.bf16.mxu0 %vm4764_vm3, %v5311_v8  ;;  %v4722_v7 = vld [vmem:[%s5820_s7 + $0xc0] sm:$0xff]  }
 0x4c4   :  { %4593 = vmatprep.subr.bf16.mxu0 %v5311_v8 }
 0x4c5   :  { %3548 = vmatprep.mubr.bf16.mxu1 %v3174_v32 }
 0x4c6   :  { %3549 = vmatmul.mubr.bf16.vlgmr.msra.gmra.mxu1 %v3173_v56 }
 0x4c7   :  { %4594 = vmatpush3.bf16.msra.mxu0 %v4688_v2  ;;  %4435 = vmatpush3.bf16.msra.mxu1 %v4693_v40 }
 0x4c8   :  { %4595 = vmatprep.subr.bf16.mxu0 %v5311_v8  ;;  %4436 = vmatprep.subr.bf16.mxu1 %v4694_v6 }
 0x4cb   :  { %4596 = vmatpush3.bf16.msra.mxu0 %v4689_v35  ;;  %4437 = vmatpush3.bf16.msra.mxu1 %v4695_v0 }
 0x4cc   :  { %4597 = vmatprep.subr.bf16.mxu0 %v5311_v8  ;;  %4438 = vmatprep.subr.bf16.mxu1 %v4696_v21 }
 0x4cf   :  { %4598 = vmatpush3.bf16.msra.mxu0 %v4690_v58  ;;  %4439 = vmatpush3.bf16.msra.mxu1 %v4698_v27  ;;  %v4725_v27 = vld [vmem:[%s5822_s9] sm:$0xff]  }
 0x4d0   :  { %4599 = vmatprep.subr.bf16.mxu0 %v5311_v8  ;;  %4440 = vmatprep.subr.bf16.mxu1 %v4700_v22 }
 0x4d3   :  { %4600 = vmatpush3.bf16.msra.mxu0 %v4691_v38  ;;  %4441 = vmatpush3.bf16.msra.mxu1 %v4702_v3 }
 0x4d4   :  { %4456 = vmatprep.subr.bf16.mxu0 %v4697_v18  ;;  %4442 = vmatprep.subr.bf16.mxu1 %v4704_v30 }
 0x4d6   :  { %4602 = vmatmul.mubr.msk.bf16.vlgmr.msra.gmra.mxu0 %vm3472_vm13, %v3175_v19 }
 0x4d7   :  { %4457 = vmatpush3.bf16.msra.mxu0 %v4699_v45  ;;  %4443 = vmatpush3.bf16.msra.mxu1 %v4706_v50 }
 0x4d8   :  { %4458 = vmatprep.subr.bf16.mxu0 %v4701_v29  ;;  %4444 = vmatprep.subr.bf16.mxu1 %v4708_v46  ;;  %v4726_v46 = vld [vmem:[%s5824_s11] sm:$0xff]  }
 0x4db   :  { %4459 = vmatpush3.bf16.msra.mxu0 %v4703_v25  ;;  %4445 = vmatpush3.bf16.msra.mxu1 %v4710_v20  ;;  %v4724_v25 = vld [vmem:[%s5822_s9 + $0x8] sm:$0xff]  }
 0x4dc   :  { %4460 = vmatprep.subr.bf16.mxu0 %v4705_v15  ;;  %4446 = vmatprep.subr.bf16.mxu1 %v4712_v31 }
 0x4df   :  { %4461 = vmatpush3.bf16.msra.mxu0 %v4707_v11  ;;  %4447 = vmatpush3.bf16.msra.mxu1 %v4714_v43 }
 0x4e0   :  { %4462 = vmatprep.subr.bf16.mxu0 %v4709_v36  ;;  %4448 = vmatprep.subr.bf16.mxu1 %v4716_v34  ;;  %v4341_v36 = vld [vmem:[%s5823_s10] ss:$0 sm:$0xff]  ;;  %s4767_s10 = smov [#allocation5]  }
 0x4e1   :  { %s4156_s11 = sshll.u32 %s4767_s10, 4  ;;  %s4157_s11 = int_to_ptr.vmem [resolvable:$true] %s4156_s11 }
 0x4e2   :  { %p4737_p1 = scmp.lt.s32.totalorder %s4157_s11, %s4157_s11 }
 0x4e3   :  { %4463 = vmatpush3.bf16.msra.mxu0 %v4711_v17  ;;  %4449 = vmatpush3.bf16.msra.mxu1 %v4718_v24 }
 0x4e4   :  { %4464 = vmatprep.subr.bf16.mxu0 %v4713_v60  ;;  %4605 = vmatprep.subr.bf16.mxu1 %v5311_v8 }
 0x4e7   :  { %4465 = vmatpush3.bf16.msra.mxu0 %v4715_v12 }
 0x4e8   :  { %4466 = vmatprep.subr.bf16.mxu0 %v4717_v39 }
 0x4eb   :  { %4467 = vmatpush3.bf16.msra.mxu0 %v4719_v47 }
 0x4ec   :  { %4468 = vmatprep.subr.bf16.mxu0 %v4720_v1 }
 0x4ef   :  { %4469 = vmatpush3.bf16.msra.mxu0 %v4721_v63 }
 0x4f0   :  { %4470 = vmatprep.subr.bf16.mxu0 %v4722_v7 }
 0x4f3   :  { %4471 = vmatpush3.bf16.msra.mxu0 %v4723_v13 }
 0x582   :  { %v4400_v37 = vpop.f32.mrf.mxu0 }
 0x584   :  { %v4401_v9 = vpop.f32.mrf.mxu0 }
 0x585   :  { %v4402_v62 = vadd.f32 %v4401_v9, %v4400_v37 }
 0x586   :  { %v4403_v54 = vpop.f32.mrf.mxu0  ;;  %v4422_v4 = vpop.f32.mrf.mxu1 }
 0x588   :  { %v4404_v10 = vpop.f32.mrf.mxu0  ;;  %v4423_v52 = vpop.f32.mrf.mxu1 }
 0x589   :  { %v4424_v23 = vadd.f32 %v4423_v52, %v4422_v4  ;;  %v4308_v4 = vld [vmem:[%s5821_s8] ss:$0 sm:$0xff] }
 0x58a   :  { %v4425_v26 = vpop.f32.mrf.mxu1 }
 0x58b   :  { %v3551_v28 = vadd.f32 %v4424_v23, %v4402_v62 }
 0x58c   :  { %v4426_v48 = vpop.f32.mrf.mxu1 }
 0x596   :  { %v3590_v33 = vpop.f32.mrf.mxu0 }
 0x597   :  { %v3591_v49 = vadd.f32 %v3590_v33, %v3551_v28 }
 0x598   :  { %v4603_v51 = vpop.f32.mrf.mxu0 }
 0x599   :  { %3633 = vrot.lane.b32.xlu0 %v3591_v49, %s4766_s14  ;;  %v3612_v55 = vrot.slane %v3591_v49, 3  ;;  %v3609_v57 = vrot.slane %v3591_v49, 2  ;;  %v3625_v53 = vrot.slane %v3591_v49, 6  ;;  %3601 = vst.msk [vmem:[#allocation4] sm:$0x1] %vm3600_vm14, %v3591_v49  ;;  %v3617_v61 = vrot.slane %v3591_v49, 4 }
 0x59a   :  { %v3593_v59 = vpop.f32.mrf.mxu0  ;;  %v3603_v42 = vrot.slane %v3591_v49, 1  ;;  %v3628_v44 = vrot.slane %v3591_v49, 7  ;;  %v3620_v14 = vrot.slane %v3591_v49, 5 }
 0x59b   :  { %3613 = vrot.lane.b32.xlu1 %v3612_v55, %s4766_s14  ;;  %3611 = vst.msk [vmem:[#allocation4 + $0x8] sm:$0x1] %vm3600_vm14, %v3609_v57  ;;  %3627 = vst.msk [vmem:[#allocation4 + $0x18] sm:$0x1] %vm3600_vm14, %v3625_v53 }
 0x59c   :  { %v4604_v5 = vpop.f32.mrf.mxu0  ;;  %3619 = vst.msk [vmem:[#allocation4 + $0x10] sm:$0x1] %vm3600_vm14, %v3617_v61 }
 0x59d   :  { %3639 = vrot.lane.b32.xlu0 %v3609_v57, %s4766_s14 }
 0x59f   :  { %3604 = vrot.lane.b32.xlu1 %v3603_v42, %s4766_s14 }
 0x5a1   :  { %3651 = vrot.lane.b32.xlu0 %v3625_v53, %s4766_s14 }
 0x5a3   :  { %3629 = vrot.lane.b32.xlu1 %v3628_v44, %s4766_s14 }
 0x5a5   :  { %3645 = vrot.lane.b32.xlu0 %v3617_v61, %s4766_s14 }
 0x5a7   :  { %3621 = vrot.lane.b32.xlu1 %v3620_v14, %s4766_s14 }
 0x60b   :  { %v3634_v32 = vpop.permute.xlu0 %3633 }
 0x60c   :  { %3636 = vst.msk [vmem:[#allocation4 + $0x1] sm:$0x1] %vm3600_vm14, %v3634_v32 }
 0x60d   :  { %3638 = vst.msk [vmem:[#allocation4 + $0x1] sm:$0x1] %vm3607_vm15, %v3603_v42  ;;  %v3614_v56 = vpop.permute.xlu1 %3613 }
 0x60e   :  { %3616 = vst.msk [vmem:[#allocation4 + $0x8] sm:$0x1] %vm3607_vm15, %v3614_v56 }
 0x60f   :  { %v3640_v2 = vpop.permute.xlu0 %3639 }
 0x610   :  { %3642 = vst.msk [vmem:[#allocation4 + $0x9] sm:$0x1] %vm3600_vm14, %v3640_v2 }
 0x611   :  { %3644 = vst.msk [vmem:[#allocation4 + $0x9] sm:$0x1] %vm3607_vm15, %v3612_v55  ;;  %v3605_v35 = vpop.permute.xlu1 %3604 }
 0x612   :  { %3608 = vst.msk [vmem:[#allocation4] sm:$0x1] %vm3607_vm15, %v3605_v35 }
 0x613   :  { %v3652_v58 = vpop.permute.xlu0 %3651 }
 0x614   :  { %3654 = vst.msk [vmem:[#allocation4 + $0x19] sm:$0x1] %vm3600_vm14, %v3652_v58 }
 0x615   :  { %3656 = vst.msk [vmem:[#allocation4 + $0x19] sm:$0x1] %vm3607_vm15, %v3628_v44  ;;  %v3630_v38 = vpop.permute.xlu1 %3629 }
 0x616   :  { %3632 = vst.msk [vmem:[#allocation4 + $0x18] sm:$0x1] %vm3607_vm15, %v3630_v38 }
 0x617   :  { %v3646_v16 = vpop.permute.xlu0 %3645 }
 0x618   :  { %3648 = vst.msk [vmem:[#allocation4 + $0x11] sm:$0x1] %vm3600_vm14, %v3646_v16  ;;  %v3658_v19 = vld [vmem:[#allocation4 + $0x8] sm:$0xff] }
 0x619   :  { %3650 = vst.msk [vmem:[#allocation4 + $0x11] sm:$0x1] %vm3607_vm15, %v3620_v14  ;;  %v3622_v41 = vpop.permute.xlu1 %3621  ;;  %v3662_v40 = vpack.c.bf16 %v3658_v19, %v3658_v19  ;;  %v3657_v6 = vld [vmem:[#allocation4] sm:$0xff] }
 0x61a   :  { %3624 = vst.msk [vmem:[#allocation4 + $0x10] sm:$0x1] %vm3607_vm15, %v3622_v41  ;;  %v3661_v18 = vpack.c.bf16 %v3657_v6, %v3657_v6 }
 0x61b   :  { %3960 = vmatprep.mubr.bf16.mxu1 %v3662_v40 }
 0x61c   :  { %3961 = vmatmul.mubr.bf16.vlgmr.msra.gmra.mxu1 %v3661_v18 }
 0x61d   :  { %v3660_v45 = vld [vmem:[#allocation4 + $0x18] sm:$0xff]  ;;  %4609 = vmatprep.mubr.msk.bf16.mxu1 %vm4764_vm3, %v5311_v8  ;;  %4606 = vmatpush3.bf16.msra.mxu1 %v4724_v25 }
 0x61e   :  { %v3664_v0 = vpack.c.bf16 %v3660_v45, %v3660_v45  ;;  %4607 = vmatprep.subr.bf16.mxu1 %v5311_v8 }
 0x620   :  { %4000 = vmatprep.mubr.bf16.mxu0 %v3664_v0 }
 0x621   :  { %v3659_v29 = vld [vmem:[#allocation4 + $0x10] sm:$0xff]  ;;  %4608 = vmatpush3.bf16.msra.mxu1 %v4725_v27 }
 0x622   :  { %v3663_v21 = vpack.c.bf16 %v3659_v29, %v3659_v29  ;;  %4613 = vmatprep.subr.bf16.mxu1 %v5311_v8 }
 0x624   :  { %4001 = vmatmul.mubr.bf16.vlgmr.msra.gmra.mxu0 %v3663_v21 }
 0x6dc   :  { %v4450_v22 = vpop.f32.mrf.mxu1 }
 0x6de   :  { %v4451_v3 = vpop.f32.mrf.mxu1 }
 0x6df   :  { %v4452_v54 = vadd.f32 %v4451_v3, %v4450_v22 }
 0x6e0   :  { %v4453_v37 = vpop.f32.mrf.mxu1 }
 0x6e1   :  { %v3963_v26 = vadd.f32 %v4452_v54, %v4308_v4 }
 0x6e2   :  { %v4454_v9 = vpop.f32.mrf.mxu1 }
 0x6e4   :  { %v4472_v10 = vpop.f32.mrf.mxu0 }
 0x6e6   :  { %v4473_v52 = vpop.f32.mrf.mxu0 }
 0x6e7   :  { %v4474_v30 = vadd.f32 %v4473_v52, %v4472_v10 }
 0x6e8   :  { %v4475_v15 = vpop.f32.mrf.mxu0 }
 0x6e9   :  { %v4003_v48 = vadd.f32 %v4474_v30, %v3963_v26 }
 0x6ea   :  { %v4476_v50 = vpop.f32.mrf.mxu0 }
 0x6eb   :  { %v4008_v11 = vpack.c.bf16 %v4003_v48, %v4003_v48 }
 0x6ed   :  { %4610 = vmatmul.mubr.msk.bf16.vlgmr.msra.gmra.mxu1 %vm4032_vm0, %v4008_v11 }
 0x6ee   :  { %4615 = vmatprep.mubr.msk.bf16.mxu1 %vm4764_vm3, %v5311_v8  ;;  %4614 = vmatpush3.bf16.msra.mxu1 %v4726_v46  ;;  %v4345_v8 = vld [vmem:[%s5825_s12] ss:$0 sm:$0xff]  ;;  %vm4148_vm3 = vcmask 205824   ;;  %s4732_s12 = scalar_lea.vmem %s4157_s11, 32 }
 0x6ef   :  { %p4733_p0 = scmp.ne.s32.totalorder %s4157_s11, %s4732_s12  ;;  %p4738_p2 = scmp.lt.s32.totalorder %s4732_s12, %s4732_s12 }
 0x6f1   :  { %p4739_p3 = por %p4738_p2, %p4737_p1 }
 0x6f3   :  { %p4740_p4 = pnand %p4739_p3, %p4733_p0 }
 0x7ad   :  { %v4070_v20 = vpop.f32.mrf.mxu1 }
 0x7ae   :  { %v4071_v17 = vadd.f32 %v4341_v36, %v4070_v20 }
 0x7af   :  { %v4611_v23 = vpop.f32.mrf.mxu1 }
 0x7b0   :  { %v4076_v62 = vpack.c.bf16 %v4071_v17, %v4071_v17 }
 0x7b1   :  { %v4073_v31 = vpop.f32.mrf.mxu1 }
 0x7b2   :  { %4616 = vmatmul.mubr.msk.bf16.vlgmr.msra.gmra.mxu1 %vm4092_vm1, %v4076_v62 }
 0x7b3   :  { %v4612_v60 = vpop.f32.mrf.mxu1 }
 0x872   :  { %v4130_v43 = vpop.f32.mrf.mxu1 }
 0x873   :  { %v4131_v12 = vadd.f32 %v4345_v8, %v4130_v43 }
 0x874   :  { %v4617_v28 = vpop.f32.mrf.mxu1 }
 0x875   :  { %v4137_v33 = vsel %vm4136_vm2, %v4131_v12, -inf }
 0x876   :  { %4138 = vmax.xlane.f32.xlu0 %v4137_v33  ;;  %v4133_v49 = vpop.f32.mrf.mxu1 }
 0x878   :  { %v4618_v34 = vpop.f32.mrf.mxu1 }
 0x8ff   :  { %v4139_v39 = vpop.xlane.xlu0 %4138 }
 0x900   :  { %v4140_v51 = vsub.f32 %v4131_v12, %v4139_v39 }
 0x902   :  { %v4141_v24 = vmul.f32 1.442695, %v4140_v51 }
 0x904   :  { %4727 = vpow2.f32 %v4141_v24 }
 0x911   :  { %v4728_v47 = vpop.eup %4727 }
 0x912   :  { %v4143_v55 = vsel %vm4136_vm2, %v4728_v47, 0.0 }
 0x913   :  { %4144 = vadd.xlane.f32.xlu1 %v4143_v55 }
 0x99c   :  { %v4145_v57 = vpop.xlane.xlu1 %4144 }
 0x99d   :  { %4729 = vrcp.f32 %v4145_v57 }
 0x9aa   :  { %v4730_v53 = vpop.eup %4729 }
 0x9ab   :  { %v4147_v59 = vmul.f32 %v4730_v53, %v4728_v47 }
 0x9ad   :  { %4149 = vst.msk [vmem:[#allocation5] sm:$0x3] %vm4148_vm3, %v4147_v59 }
 0x9ae   :  { %4743 = shalt.err (!%p4740_p4)
}
 0x9af   :  { %4159 = dma.vmem_to_hbm [thread:$0]  %s4157_s11, 32, %s5826_s13, [#allocation6]  }
 0x9b0   :  { %4752 = dma.done.wait [#allocation6], 32  }
 0x9b1   :  { %4753 = vsyncadd [#allocation6], 4294967264 }
 0x9b2   :  { %4163 = vsyncpa [#allocation6], 1 }

</bundles_post_ra>
